<compile_context>
chip_gen: v7x
topology: tpu7x:2x2x1
jax: 0.10.0
libtpu: 0.0.40
codegen_flags: <defaults>
</compile_context>

<pallas_src>
import functools

import jax
import jax.numpy as jnp
from jax.experimental import pallas as pl
from jax.experimental.pallas import tpu as pltpu


_LANE = 128
_DEFAULT_TILE_BUDGET = 2 * 1024 * 1024   # ~2 MiB per VMEM tile buffer


def _round_up(x: int, m: int) -> int:
    return ((x + m - 1) // m) * m


def _transpose_kernel(x_ref, o_ref):
    # One (tl, tm) -> (tm, tl) tile transpose (XLU); the kernel is
    # HBM-bandwidth bound, the transpose itself has huge slack.
    # TODO(synk): if a bundle dump ever shows vreg spills on the largest
    # tiles, split this into 128x128 sub-blocks with an unrolled fori_loop.
    o_ref[...] = x_ref[...].T


def permuted_consumer_block_spec(tl: int, tm: int) -> pl.BlockSpec:
    """BlockSpec a *consumer* kernel can use to fold this permute away.

    Give the consumer the (L, B, C) tensor reshaped to (L, M=B*C); with this
    in_spec on a grid (m, l) it receives the (tl, tm) block whose transpose is
    the (tm, tl) tile of the permuted (B*C, L) view — transpose it in-register
    (`blk[...].T`) and skip the standalone HBM round trip entirely.
    """
    return pl.BlockSpec((tl, tm), lambda m, l, *prefetch: (l, m))


def _choose_tiles(L: int, M: int, itemsize: int, budget: int):
    """Pick (tl, tm, Lp, Mp): tile sizes and padded extents."""
    # --- tm: input lane dim / output sublane dim -----------------------
    # Pointnet regime: M = B*C is a few hundred..couple thousand -> take the
    # whole of M so every input block is one contiguous HBM read (tm == full
    # extent is always legal under the (8,128) rule).
    if M * _LANE * itemsize <= budget:
        tm, Mp = M, M
    else:
        # Large M: lane-aligned 512-wide chunks (>=2 KiB per DMA row chunk,
        # <512 columns of zero-padding waste).
        tm = 4 * _LANE
        Mp = _round_up(M, tm)

    # --- tl: input sublane dim / output lane dim ------------------------
    # Multiple of 128 => unmasked, lane-dense output stores; as large as the
    # per-buffer budget allows (capped at 2048), never more than padded L.
    tl = (budget // (tm * itemsize)) // _LANE * _LANE
    tl = max(_LANE, min(2048, tl))
    tl = min(tl, _round_up(L, _LANE))
    Lp = _round_up(L, tl)
    return tl, tm, Lp, Mp


@functools.partial(
    jax.jit,
    static_argnames=("embed_dim", "height", "width", "tile_budget_bytes"))
def unflatten(x, embed_dim, height, width,
              tile_budget_bytes=_DEFAULT_TILE_BUDGET):
    """x: (L, B, C) -> (B, embed_dim, height, width), L == height * width."""
    L, B, C = x.shape
    assert C == embed_dim, f"embed_dim mismatch: {C} vs {embed_dim}"
    assert L == height * width, f"seq_len {L} != height*width {height * width}"

    M = B * C
    itemsize = jnp.dtype(x.dtype).itemsize
    # Free (metadata-only) reshape of the contiguous input: (L, B, C) -> (L, M).
    x2d = x.reshape(L, M)

    tl, tm, Lp, Mp = _choose_tiles(L, M, itemsize, tile_budget_bytes)

    # Pad ragged edges up to the tile grid (replaces the old full-extent
    # fallback that could blow past scoped/physical VMEM); no-op when the
    # shape is already tile-aligned.
    padded = (Lp, Mp) != (L, M)
    if padded:
        x2d = jnp.pad(x2d, ((0, Lp - L), (0, Mp - M)))

    grid = (Mp // tm, Lp // tl)

    out2d = pl.pallas_call(
        _transpose_kernel,
        out_shape=jax.ShapeDtypeStruct((Mp, Lp), x.dtype),
        grid=grid,
        # grid point (m, l): read x2d[l*tl:(l+1)*tl, m*tm:(m+1)*tm] ...
        in_specs=[pl.BlockSpec((tl, tm), lambda m, l: (l, m))],
        # ... and write its transpose to out2d[m*tm:(m+1)*tm, l*tl:(l+1)*tl].
        out_specs=pl.BlockSpec((tm, tl), lambda m, l: (m, l)),
        compiler_params=pltpu.CompilerParams(
            # "parallel" shards steps across v7x's two TensorCores; measured
            # no-op (harmless) on single-core v5e/v6e.
            dimension_semantics=("parallel", "parallel"),
            # Explicit headroom so larger tiles never trip v5e's 16 MiB
            # scoped-VMEM default; actual working set is ~4x tile <= ~8 MiB.
            vmem_limit_bytes=32 * 1024 * 1024),
        cost_estimate=pl.CostEstimate(
            flops=0,
            transcendentals=0,
            bytes_accessed=2 * Lp * Mp * itemsize),
    )(x2d)

    if padded:
        out2d = out2d[:M, :L]

    # out2d is the contiguous (B, C, L) element order, so the final
    # view(-1, C, H, W) is again a free reshape.
    return out2d.reshape(B, embed_dim, height, width)


def _reference(x, embed_dim, height, width):
    # Exact PyTorch semantics (permute(1,2,0).view(-1, C, H, W)) in plain JAX.
    return jnp.transpose(x, (1, 2, 0)).reshape(-1, embed_dim, height, width)


if __name__ == "__main__":
    key = jax.random.PRNGKey(0)

    # Case 1: tile-aligned shape — no padding, single resident block
    # (small-tensor fast path), lane-dense stores.
    embed_dim, height, width, B = 128, 32, 32, 2
    L = height * width
    x = jax.random.normal(key, (L, B, embed_dim), dtype=jnp.float32)
    out = jax.block_until_ready(unflatten(x, embed_dim, height, width))
    ref = _reference(x, embed_dim, height, width)
    assert out.shape == (B, embed_dim, height, width), out.shape
    assert out.dtype == x.dtype
    assert jnp.array_equal(out, ref), "case 1 mismatch vs reference"

    # Case 2: ragged shape (L = 500, M = 192 — neither a multiple of 128),
    # exercising the pad-and-slice path that replaced the full-extent fallback.
    embed_dim2, height2, width2, B2 = 96, 20, 25, 2
    L2 = height2 * width2
    x2 = jax.random.normal(jax.random.PRNGKey(1), (L2, B2, embed_dim2),
                           dtype=jnp.float32)
    out2 = jax.block_until_ready(unflatten(x2, embed_dim2, height2, width2))
    ref2 = _reference(x2, embed_dim2, height2, width2)
    assert out2.shape == (B2, embed_dim2, height2, width2), out2.shape
    assert jnp.array_equal(out2, ref2), "case 2 mismatch vs reference"

    # Case 3: same data as case 1 but with a tiny tile budget to force a
    # multi-step grid (1, 8) — exercises the software pipeline and gives
    # both v7x TensorCores several steps each.
    out3 = jax.block_until_ready(
        unflatten(x, embed_dim, height, width, tile_budget_bytes=128 * 1024))
    assert jnp.array_equal(out3, ref), "case 3 mismatch vs reference"

    print("KERNEL_OK")
</pallas_src>

<mosaic_0001>
module attributes {stable_mosaic.version = 11 : i64} {
  func.func @_transpose_kernel(%arg0: i32, %arg1: i32, %arg2: memref<1024x256xf32, #tpu.memory_space<vmem>>, %arg3: memref<256x1024xf32, #tpu.memory_space<vmem>>) attributes {dimension_semantics = [#tpu.dimension_semantics<parallel>, #tpu.dimension_semantics<parallel>], iteration_bounds = array<i64: 1, 1>, scalar_prefetch = 0 : i64, scratch_operands = 0 : i64, tpu.core_type = #tpu.core_type<tc>, window_params = [{transform_indices = @transform_0, window_bounds = array<i64: 1024, 256>}, {transform_indices = @transform_1, window_bounds = array<i64: 256, 1024>}]} {
    %c0 = arith.constant 0 : index
    %c0_0 = arith.constant 0 : index
    %0 = vector.load %arg2[%c0, %c0_0] : memref<1024x256xf32, #tpu.memory_space<vmem>>, vector<1024x256xf32>
    %1 = tpu.transpose %0, [1, 0] : vector<1024x256xf32> -> vector<256x1024xf32>
    %c0_1 = arith.constant 0 : index
    %c0_2 = arith.constant 0 : index
    %2 = vector.load %arg3[%c0_1, %c0_2] : memref<256x1024xf32, #tpu.memory_space<vmem>>, vector<256x1024xf32>
    tpu.vector_store %arg3[%c0_1, %c0_2], %1 {strides = array<i32>} : memref<256x1024xf32, #tpu.memory_space<vmem>>, vector<256x1024xf32>,
    return
  }
  func.func @transform_0(%arg0: i32, %arg1: i32) -> (i32, i32) {
    %c0_i32 = arith.constant 0 : i32
    return %arg1, %arg0 : i32, i32
  }
  func.func @transform_1(%arg0: i32, %arg1: i32) -> (i32, i32) {
    %c0_i32 = arith.constant 0 : i32
    return %arg0, %arg1 : i32, i32
  }
}

</mosaic_0001>

<bundles_post_ra>
// kernel: unflatten.1
= control target key start
LH: loop header
LB: loop body
LE: loop exit
PB: predicated region body
PF: predicated region fallthrough
CT: control target
= control target key end

     0   :  { %s2582_s0 = inlined_call_operand.vmem [shape: f32[1024,256], index: 0, kind: input, shape index: {}]   ;;  %s2583_s1 = inlined_call_operand.vmem [shape: f32[256,1024], index: 1, kind: output, shape index: {}]  }
   0x1   :  { %v9_v0 = vld [vmem:[%s2582_s0 + $0x8] sm:$0xff]  ;;  %v8_v1 = vld [vmem:[%s2582_s0] sm:$0xff]  ;;  %v11_v2 = vld [vmem:[%s2582_s0 + $0x18] sm:$0xff] }
   0x2   :  { %296 = vxpose.xlu1.b32.start [1/16] %v9_v0, 128  ;;  %264 = vxpose.xlu0.b32.start [1/16] %v8_v1, 128  ;;  %v10_v3 = vld [vmem:[%s2582_s0 + $0x10] sm:$0xff]  ;;  %v13_v4 = vld [vmem:[%s2582_s0 + $0x28] sm:$0xff]  ;;  %v12_v5 = vld [vmem:[%s2582_s0 + $0x20] sm:$0xff] }
   0x3   :  { %v15_v6 = vld [vmem:[%s2582_s0 + $0x38] sm:$0xff]  ;;  %v14_v7 = vld [vmem:[%s2582_s0 + $0x30] sm:$0xff]  ;;  %v17_v8 = vld [vmem:[%s2582_s0 + $0x48] sm:$0xff] }
   0x4   :  { %v16_v9 = vld [vmem:[%s2582_s0 + $0x40] sm:$0xff]  ;;  %v19_v10 = vld [vmem:[%s2582_s0 + $0x58] sm:$0xff]  ;;  %v18_v11 = vld [vmem:[%s2582_s0 + $0x50] sm:$0xff] }
   0x5   :  { %v21_v12 = vld [vmem:[%s2582_s0 + $0x68] sm:$0xff]  ;;  %v20_v13 = vld [vmem:[%s2582_s0 + $0x60] sm:$0xff]  ;;  %v23_v14 = vld [vmem:[%s2582_s0 + $0x78] sm:$0xff] }
   0x6   :  { %297 = vxpose.xlu1.b32.cont [2/16] %v11_v2, 128  ;;  %265 = vxpose.xlu0.b32.cont [2/16] %v10_v3, 128  ;;  %v22_v15 = vld [vmem:[%s2582_s0 + $0x70] sm:$0xff]  ;;  %v25_v16 = vld [vmem:[%s2582_s0 + $0x88] sm:$0xff]  ;;  %v24_v17 = vld [vmem:[%s2582_s0 + $0x80] sm:$0xff] }
   0x7   :  { %v27_v18 = vld [vmem:[%s2582_s0 + $0x98] sm:$0xff]  ;;  %v26_v19 = vld [vmem:[%s2582_s0 + $0x90] sm:$0xff]  ;;  %v29_v20 = vld [vmem:[%s2582_s0 + $0xa8] sm:$0xff] }
   0x8   :  { %v28_v21 = vld [vmem:[%s2582_s0 + $0xa0] sm:$0xff]  ;;  %v31_v22 = vld [vmem:[%s2582_s0 + $0xb8] sm:$0xff]  ;;  %v30_v23 = vld [vmem:[%s2582_s0 + $0xb0] sm:$0xff] }
   0x9   :  { %v33_v24 = vld [vmem:[%s2582_s0 + $0xc8] sm:$0xff]  ;;  %v32_v25 = vld [vmem:[%s2582_s0 + $0xc0] sm:$0xff]  ;;  %v35_v26 = vld [vmem:[%s2582_s0 + $0xd8] sm:$0xff] }
   0xa   :  { %298 = vxpose.xlu1.b32.cont [3/16] %v13_v4, 128  ;;  %266 = vxpose.xlu0.b32.cont [3/16] %v12_v5, 128  ;;  %v34_v27 = vld [vmem:[%s2582_s0 + $0xd0] sm:$0xff]  ;;  %v37_v28 = vld [vmem:[%s2582_s0 + $0xe8] sm:$0xff]  ;;  %v36_v29 = vld [vmem:[%s2582_s0 + $0xe0] sm:$0xff] }
   0xb   :  { %v39_v30 = vld [vmem:[%s2582_s0 + $0xf8] sm:$0xff]  ;;  %v38_v31 = vld [vmem:[%s2582_s0 + $0xf0] sm:$0xff]  ;;  %v41_v32 = vld [vmem:[%s2582_s0 + $0x108] sm:$0xff] }
   0xc   :  { %v40_v33 = vld [vmem:[%s2582_s0 + $0x100] sm:$0xff]  ;;  %v43_v34 = vld [vmem:[%s2582_s0 + $0x118] sm:$0xff]  ;;  %v42_v35 = vld [vmem:[%s2582_s0 + $0x110] sm:$0xff] }
   0xd   :  { %v45_v36 = vld [vmem:[%s2582_s0 + $0x128] sm:$0xff]  ;;  %v44_v37 = vld [vmem:[%s2582_s0 + $0x120] sm:$0xff]  ;;  %v47_v38 = vld [vmem:[%s2582_s0 + $0x138] sm:$0xff] }
   0xe   :  { %299 = vxpose.xlu1.b32.cont [4/16] %v15_v6, 128  ;;  %267 = vxpose.xlu0.b32.cont [4/16] %v14_v7, 128  ;;  %v46_v39 = vld [vmem:[%s2582_s0 + $0x130] sm:$0xff]  ;;  %v49_v40 = vld [vmem:[%s2582_s0 + $0x148] sm:$0xff]  ;;  %v48_v41 = vld [vmem:[%s2582_s0 + $0x140] sm:$0xff] }
   0xf   :  { %v51_v42 = vld [vmem:[%s2582_s0 + $0x158] sm:$0xff]  ;;  %v50_v43 = vld [vmem:[%s2582_s0 + $0x150] sm:$0xff]  ;;  %v53_v44 = vld [vmem:[%s2582_s0 + $0x168] sm:$0xff] }
  0x10   :  { %v52_v45 = vld [vmem:[%s2582_s0 + $0x160] sm:$0xff]  ;;  %v55_v46 = vld [vmem:[%s2582_s0 + $0x178] sm:$0xff]  ;;  %v54_v47 = vld [vmem:[%s2582_s0 + $0x170] sm:$0xff] }
  0x11   :  { %v57_v48 = vld [vmem:[%s2582_s0 + $0x188] sm:$0xff]  ;;  %v56_v49 = vld [vmem:[%s2582_s0 + $0x180] sm:$0xff]  ;;  %v59_v50 = vld [vmem:[%s2582_s0 + $0x198] sm:$0xff] }
  0x12   :  { %300 = vxpose.xlu1.b32.cont [5/16] %v17_v8, 128  ;;  %268 = vxpose.xlu0.b32.cont [5/16] %v16_v9, 128  ;;  %v58_v51 = vld [vmem:[%s2582_s0 + $0x190] sm:$0xff]  ;;  %v61_v52 = vld [vmem:[%s2582_s0 + $0x1a8] sm:$0xff]  ;;  %v60_v53 = vld [vmem:[%s2582_s0 + $0x1a0] sm:$0xff] }
  0x13   :  { %v63_v54 = vld [vmem:[%s2582_s0 + $0x1b8] sm:$0xff]  ;;  %v62_v55 = vld [vmem:[%s2582_s0 + $0x1b0] sm:$0xff]  ;;  %v65_v56 = vld [vmem:[%s2582_s0 + $0x1c8] sm:$0xff] }
  0x14   :  { %v64_v57 = vld [vmem:[%s2582_s0 + $0x1c0] sm:$0xff]  ;;  %v67_v58 = vld [vmem:[%s2582_s0 + $0x1d8] sm:$0xff]  ;;  %v66_v59 = vld [vmem:[%s2582_s0 + $0x1d0] sm:$0xff] }
  0x15   :  { %v69_v60 = vld [vmem:[%s2582_s0 + $0x1e8] sm:$0xff]  ;;  %v68_v61 = vld [vmem:[%s2582_s0 + $0x1e0] sm:$0xff]  ;;  %v71_v62 = vld [vmem:[%s2582_s0 + $0x1f8] sm:$0xff] }
  0x16   :  { %301 = vxpose.xlu1.b32.cont [6/16] %v19_v10, 128  ;;  %269 = vxpose.xlu0.b32.cont [6/16] %v18_v11, 128  ;;  %v70_v63 = vld [vmem:[%s2582_s0 + $0x1f0] sm:$0xff]  ;;  %v73_v0 = vld [vmem:[%s2582_s0 + $0x208] sm:$0xff]  ;;  %v72_v1 = vld [vmem:[%s2582_s0 + $0x200] sm:$0xff] }
  0x17   :  { %v75_v4 = vld [vmem:[%s2582_s0 + $0x218] sm:$0xff]  ;;  %v74_v5 = vld [vmem:[%s2582_s0 + $0x210] sm:$0xff]  ;;  %v77_v8 = vld [vmem:[%s2582_s0 + $0x228] sm:$0xff] }
  0x18   :  { %v76_v9 = vld [vmem:[%s2582_s0 + $0x220] sm:$0xff] }
  0x1a   :  { %302 = vxpose.xlu1.b32.cont [7/16] %v21_v12, 128  ;;  %270 = vxpose.xlu0.b32.cont [7/16] %v20_v13, 128  ;;  %v79_v12 = vld [vmem:[%s2582_s0 + $0x238] sm:$0xff]  ;;  %v78_v13 = vld [vmem:[%s2582_s0 + $0x230] sm:$0xff] }
  0x1e   :  { %303 = vxpose.xlu1.b32.cont [8/16] %v23_v14, 128  ;;  %271 = vxpose.xlu0.b32.cont [8/16] %v22_v15, 128 }
  0x22   :  { %304 = vxpose.xlu1.b32.cont [9/16] %v25_v16, 128  ;;  %272 = vxpose.xlu0.b32.cont [9/16] %v24_v17, 128  ;;  %v81_v16 = vld [vmem:[%s2582_s0 + $0x248] sm:$0xff]  ;;  %v80_v17 = vld [vmem:[%s2582_s0 + $0x240] sm:$0xff] }
  0x26   :  { %305 = vxpose.xlu1.b32.cont [10/16] %v27_v18, 128  ;;  %273 = vxpose.xlu0.b32.cont [10/16] %v26_v19, 128 }
  0x2a   :  { %306 = vxpose.xlu1.b32.cont [11/16] %v29_v20, 128  ;;  %274 = vxpose.xlu0.b32.cont [11/16] %v28_v21, 128  ;;  %v83_v20 = vld [vmem:[%s2582_s0 + $0x258] sm:$0xff]  ;;  %v82_v21 = vld [vmem:[%s2582_s0 + $0x250] sm:$0xff] }
  0x2e   :  { %307 = vxpose.xlu1.b32.cont [12/16] %v31_v22, 128  ;;  %275 = vxpose.xlu0.b32.cont [12/16] %v30_v23, 128 }
  0x32   :  { %308 = vxpose.xlu1.b32.cont [13/16] %v33_v24, 128  ;;  %276 = vxpose.xlu0.b32.cont [13/16] %v32_v25, 128  ;;  %v85_v24 = vld [vmem:[%s2582_s0 + $0x268] sm:$0xff]  ;;  %v84_v25 = vld [vmem:[%s2582_s0 + $0x260] sm:$0xff] }
  0x36   :  { %309 = vxpose.xlu1.b32.cont [14/16] %v35_v26, 128  ;;  %277 = vxpose.xlu0.b32.cont [14/16] %v34_v27, 128 }
  0x3a   :  { %310 = vxpose.xlu1.b32.cont [15/16] %v37_v28, 128  ;;  %278 = vxpose.xlu0.b32.cont [15/16] %v36_v29, 128  ;;  %v87_v28 = vld [vmem:[%s2582_s0 + $0x278] sm:$0xff]  ;;  %v86_v29 = vld [vmem:[%s2582_s0 + $0x270] sm:$0xff] }
  0x3e   :  { %311 = vxpose.xlu1.b32.end [16/16] %v39_v30, 128  ;;  %279 = vxpose.xlu0.b32.end [16/16] %v38_v31, 128 }
  0x42   :  { %360 = vxpose.xlu1.b32.start [1/16] %v41_v32, 128  ;;  %328 = vxpose.xlu0.b32.start [1/16] %v40_v33, 128  ;;  %v89_v32 = vld [vmem:[%s2582_s0 + $0x288] sm:$0xff]  ;;  %v88_v33 = vld [vmem:[%s2582_s0 + $0x280] sm:$0xff] }
  0x46   :  { %361 = vxpose.xlu1.b32.cont [2/16] %v43_v34, 128  ;;  %329 = vxpose.xlu0.b32.cont [2/16] %v42_v35, 128 }
  0x4a   :  { %362 = vxpose.xlu1.b32.cont [3/16] %v45_v36, 128  ;;  %330 = vxpose.xlu0.b32.cont [3/16] %v44_v37, 128  ;;  %v91_v36 = vld [vmem:[%s2582_s0 + $0x298] sm:$0xff]  ;;  %v90_v37 = vld [vmem:[%s2582_s0 + $0x290] sm:$0xff] }
  0x4e   :  { %363 = vxpose.xlu1.b32.cont [4/16] %v47_v38, 128  ;;  %331 = vxpose.xlu0.b32.cont [4/16] %v46_v39, 128 }
  0x52   :  { %364 = vxpose.xlu1.b32.cont [5/16] %v49_v40, 128  ;;  %332 = vxpose.xlu0.b32.cont [5/16] %v48_v41, 128  ;;  %v93_v40 = vld [vmem:[%s2582_s0 + $0x2a8] sm:$0xff]  ;;  %v92_v41 = vld [vmem:[%s2582_s0 + $0x2a0] sm:$0xff] }
  0x56   :  { %365 = vxpose.xlu1.b32.cont [6/16] %v51_v42, 128  ;;  %333 = vxpose.xlu0.b32.cont [6/16] %v50_v43, 128 }
  0x5a   :  { %366 = vxpose.xlu1.b32.cont [7/16] %v53_v44, 128  ;;  %334 = vxpose.xlu0.b32.cont [7/16] %v52_v45, 128  ;;  %v95_v44 = vld [vmem:[%s2582_s0 + $0x2b8] sm:$0xff]  ;;  %v94_v45 = vld [vmem:[%s2582_s0 + $0x2b0] sm:$0xff] }
  0x5e   :  { %367 = vxpose.xlu1.b32.cont [8/16] %v55_v46, 128  ;;  %335 = vxpose.xlu0.b32.cont [8/16] %v54_v47, 128 }
  0x62   :  { %368 = vxpose.xlu1.b32.cont [9/16] %v57_v48, 128  ;;  %336 = vxpose.xlu0.b32.cont [9/16] %v56_v49, 128  ;;  %v97_v48 = vld [vmem:[%s2582_s0 + $0x2c8] sm:$0xff]  ;;  %v96_v49 = vld [vmem:[%s2582_s0 + $0x2c0] sm:$0xff] }
  0x66   :  { %369 = vxpose.xlu1.b32.cont [10/16] %v59_v50, 128  ;;  %337 = vxpose.xlu0.b32.cont [10/16] %v58_v51, 128 }
  0x6a   :  { %370 = vxpose.xlu1.b32.cont [11/16] %v61_v52, 128  ;;  %338 = vxpose.xlu0.b32.cont [11/16] %v60_v53, 128  ;;  %v99_v52 = vld [vmem:[%s2582_s0 + $0x2d8] sm:$0xff]  ;;  %v98_v53 = vld [vmem:[%s2582_s0 + $0x2d0] sm:$0xff] }
  0x6e   :  { %371 = vxpose.xlu1.b32.cont [12/16] %v63_v54, 128  ;;  %339 = vxpose.xlu0.b32.cont [12/16] %v62_v55, 128 }
  0x72   :  { %372 = vxpose.xlu1.b32.cont [13/16] %v65_v56, 128  ;;  %340 = vxpose.xlu0.b32.cont [13/16] %v64_v57, 128  ;;  %v101_v56 = vld [vmem:[%s2582_s0 + $0x2e8] sm:$0xff]  ;;  %v100_v57 = vld [vmem:[%s2582_s0 + $0x2e0] sm:$0xff] }
  0x76   :  { %373 = vxpose.xlu1.b32.cont [14/16] %v67_v58, 128  ;;  %341 = vxpose.xlu0.b32.cont [14/16] %v66_v59, 128 }
  0x7a   :  { %374 = vxpose.xlu1.b32.cont [15/16] %v69_v60, 128  ;;  %342 = vxpose.xlu0.b32.cont [15/16] %v68_v61, 128  ;;  %v103_v60 = vld [vmem:[%s2582_s0 + $0x2f8] sm:$0xff]  ;;  %v102_v61 = vld [vmem:[%s2582_s0 + $0x2f0] sm:$0xff] }
  0x7e   :  { %375 = vxpose.xlu1.b32.end [16/16] %v71_v62, 128  ;;  %343 = vxpose.xlu0.b32.end [16/16] %v70_v63, 128 }
  0x82   :  { %424 = vxpose.xlu1.b32.start [1/16] %v73_v0, 128  ;;  %v312_v2 = vpop.trf.xlu1  ;;  %392 = vxpose.xlu0.b32.start [1/16] %v72_v1, 128  ;;  %v280_v3 = vpop.trf.xlu0  ;;  %v105_v0 = vld [vmem:[%s2582_s0 + $0x308] sm:$0xff]  ;;  %v104_v1 = vld [vmem:[%s2582_s0 + $0x300] sm:$0xff] }
  0x83   :  { %904 = vst [vmem:[%s2583_s1 + $0x400] sm:$0xff] %v312_v2  ;;  %776 = vst [vmem:[%s2583_s1] sm:$0xff] %v280_v3 }
  0x86   :  { %425 = vxpose.xlu1.b32.cont [2/16] %v75_v4, 128  ;;  %v313_v6 = vpop.trf.xlu1  ;;  %393 = vxpose.xlu0.b32.cont [2/16] %v74_v5, 128  ;;  %v281_v7 = vpop.trf.xlu0  ;;  %v107_v4 = vld [vmem:[%s2582_s0 + $0x318] sm:$0xff]  ;;  %v106_v5 = vld [vmem:[%s2582_s0 + $0x310] sm:$0xff] }
  0x87   :  { %912 = vst [vmem:[%s2583_s1 + $0x440] sm:$0xff] %v313_v6  ;;  %784 = vst [vmem:[%s2583_s1 + $0x40] sm:$0xff] %v281_v7 }
  0x8a   :  { %426 = vxpose.xlu1.b32.cont [3/16] %v77_v8, 128  ;;  %v314_v10 = vpop.trf.xlu1  ;;  %394 = vxpose.xlu0.b32.cont [3/16] %v76_v9, 128  ;;  %v282_v11 = vpop.trf.xlu0  ;;  %v109_v8 = vld [vmem:[%s2582_s0 + $0x328] sm:$0xff]  ;;  %v108_v9 = vld [vmem:[%s2582_s0 + $0x320] sm:$0xff] }
  0x8b   :  { %920 = vst [vmem:[%s2583_s1 + $0x480] sm:$0xff] %v314_v10  ;;  %792 = vst [vmem:[%s2583_s1 + $0x80] sm:$0xff] %v282_v11 }
  0x8e   :  { %427 = vxpose.xlu1.b32.cont [4/16] %v79_v12, 128  ;;  %v315_v14 = vpop.trf.xlu1  ;;  %395 = vxpose.xlu0.b32.cont [4/16] %v78_v13, 128  ;;  %v283_v15 = vpop.trf.xlu0  ;;  %v111_v12 = vld [vmem:[%s2582_s0 + $0x338] sm:$0xff]  ;;  %v110_v13 = vld [vmem:[%s2582_s0 + $0x330] sm:$0xff] }
  0x8f   :  { %928 = vst [vmem:[%s2583_s1 + $0x4c0] sm:$0xff] %v315_v14  ;;  %800 = vst [vmem:[%s2583_s1 + $0xc0] sm:$0xff] %v283_v15 }
  0x92   :  { %428 = vxpose.xlu1.b32.cont [5/16] %v81_v16, 128  ;;  %v316_v18 = vpop.trf.xlu1  ;;  %396 = vxpose.xlu0.b32.cont [5/16] %v80_v17, 128  ;;  %v284_v19 = vpop.trf.xlu0  ;;  %v113_v16 = vld [vmem:[%s2582_s0 + $0x348] sm:$0xff]  ;;  %v112_v17 = vld [vmem:[%s2582_s0 + $0x340] sm:$0xff] }
  0x93   :  { %936 = vst [vmem:[%s2583_s1 + $0x500] sm:$0xff] %v316_v18  ;;  %808 = vst [vmem:[%s2583_s1 + $0x100] sm:$0xff] %v284_v19 }
  0x96   :  { %429 = vxpose.xlu1.b32.cont [6/16] %v83_v20, 128  ;;  %v317_v22 = vpop.trf.xlu1  ;;  %397 = vxpose.xlu0.b32.cont [6/16] %v82_v21, 128  ;;  %v285_v23 = vpop.trf.xlu0  ;;  %v115_v20 = vld [vmem:[%s2582_s0 + $0x358] sm:$0xff]  ;;  %v114_v21 = vld [vmem:[%s2582_s0 + $0x350] sm:$0xff] }
  0x97   :  { %944 = vst [vmem:[%s2583_s1 + $0x540] sm:$0xff] %v317_v22  ;;  %816 = vst [vmem:[%s2583_s1 + $0x140] sm:$0xff] %v285_v23 }
  0x9a   :  { %430 = vxpose.xlu1.b32.cont [7/16] %v85_v24, 128  ;;  %v318_v26 = vpop.trf.xlu1  ;;  %398 = vxpose.xlu0.b32.cont [7/16] %v84_v25, 128  ;;  %v286_v27 = vpop.trf.xlu0  ;;  %v117_v24 = vld [vmem:[%s2582_s0 + $0x368] sm:$0xff]  ;;  %v116_v25 = vld [vmem:[%s2582_s0 + $0x360] sm:$0xff] }
  0x9b   :  { %952 = vst [vmem:[%s2583_s1 + $0x580] sm:$0xff] %v318_v26  ;;  %824 = vst [vmem:[%s2583_s1 + $0x180] sm:$0xff] %v286_v27 }
  0x9e   :  { %431 = vxpose.xlu1.b32.cont [8/16] %v87_v28, 128  ;;  %v319_v30 = vpop.trf.xlu1  ;;  %399 = vxpose.xlu0.b32.cont [8/16] %v86_v29, 128  ;;  %v287_v31 = vpop.trf.xlu0  ;;  %v119_v28 = vld [vmem:[%s2582_s0 + $0x378] sm:$0xff]  ;;  %v118_v29 = vld [vmem:[%s2582_s0 + $0x370] sm:$0xff] }
  0x9f   :  { %960 = vst [vmem:[%s2583_s1 + $0x5c0] sm:$0xff] %v319_v30  ;;  %832 = vst [vmem:[%s2583_s1 + $0x1c0] sm:$0xff] %v287_v31 }
  0xa2   :  { %432 = vxpose.xlu1.b32.cont [9/16] %v89_v32, 128  ;;  %v320_v34 = vpop.trf.xlu1  ;;  %400 = vxpose.xlu0.b32.cont [9/16] %v88_v33, 128  ;;  %v288_v35 = vpop.trf.xlu0  ;;  %v121_v32 = vld [vmem:[%s2582_s0 + $0x388] sm:$0xff]  ;;  %v120_v33 = vld [vmem:[%s2582_s0 + $0x380] sm:$0xff] }
  0xa3   :  { %968 = vst [vmem:[%s2583_s1 + $0x600] sm:$0xff] %v320_v34  ;;  %840 = vst [vmem:[%s2583_s1 + $0x200] sm:$0xff] %v288_v35 }
  0xa6   :  { %433 = vxpose.xlu1.b32.cont [10/16] %v91_v36, 128  ;;  %v321_v38 = vpop.trf.xlu1  ;;  %401 = vxpose.xlu0.b32.cont [10/16] %v90_v37, 128  ;;  %v289_v39 = vpop.trf.xlu0  ;;  %v123_v36 = vld [vmem:[%s2582_s0 + $0x398] sm:$0xff]  ;;  %v122_v37 = vld [vmem:[%s2582_s0 + $0x390] sm:$0xff] }
  0xa7   :  { %976 = vst [vmem:[%s2583_s1 + $0x640] sm:$0xff] %v321_v38  ;;  %848 = vst [vmem:[%s2583_s1 + $0x240] sm:$0xff] %v289_v39 }
  0xaa   :  { %434 = vxpose.xlu1.b32.cont [11/16] %v93_v40, 128  ;;  %v322_v42 = vpop.trf.xlu1  ;;  %402 = vxpose.xlu0.b32.cont [11/16] %v92_v41, 128  ;;  %v290_v43 = vpop.trf.xlu0  ;;  %v125_v40 = vld [vmem:[%s2582_s0 + $0x3a8] sm:$0xff]  ;;  %v124_v41 = vld [vmem:[%s2582_s0 + $0x3a0] sm:$0xff] }
  0xab   :  { %984 = vst [vmem:[%s2583_s1 + $0x680] sm:$0xff] %v322_v42  ;;  %856 = vst [vmem:[%s2583_s1 + $0x280] sm:$0xff] %v290_v43 }
  0xae   :  { %435 = vxpose.xlu1.b32.cont [12/16] %v95_v44, 128  ;;  %v323_v46 = vpop.trf.xlu1  ;;  %403 = vxpose.xlu0.b32.cont [12/16] %v94_v45, 128  ;;  %v291_v47 = vpop.trf.xlu0  ;;  %v127_v44 = vld [vmem:[%s2582_s0 + $0x3b8] sm:$0xff]  ;;  %v126_v45 = vld [vmem:[%s2582_s0 + $0x3b0] sm:$0xff] }
  0xaf   :  { %992 = vst [vmem:[%s2583_s1 + $0x6c0] sm:$0xff] %v323_v46  ;;  %864 = vst [vmem:[%s2583_s1 + $0x2c0] sm:$0xff] %v291_v47 }
  0xb2   :  { %436 = vxpose.xlu1.b32.cont [13/16] %v97_v48, 128  ;;  %v324_v50 = vpop.trf.xlu1  ;;  %404 = vxpose.xlu0.b32.cont [13/16] %v96_v49, 128  ;;  %v292_v51 = vpop.trf.xlu0  ;;  %v129_v48 = vld [vmem:[%s2582_s0 + $0x3c8] sm:$0xff]  ;;  %v128_v49 = vld [vmem:[%s2582_s0 + $0x3c0] sm:$0xff] }
  0xb3   :  { %1000 = vst [vmem:[%s2583_s1 + $0x700] sm:$0xff] %v324_v50  ;;  %872 = vst [vmem:[%s2583_s1 + $0x300] sm:$0xff] %v292_v51 }
  0xb6   :  { %437 = vxpose.xlu1.b32.cont [14/16] %v99_v52, 128  ;;  %v325_v54 = vpop.trf.xlu1  ;;  %405 = vxpose.xlu0.b32.cont [14/16] %v98_v53, 128  ;;  %v293_v55 = vpop.trf.xlu0  ;;  %v131_v52 = vld [vmem:[%s2582_s0 + $0x3d8] sm:$0xff]  ;;  %v130_v53 = vld [vmem:[%s2582_s0 + $0x3d0] sm:$0xff] }
  0xb7   :  { %1008 = vst [vmem:[%s2583_s1 + $0x740] sm:$0xff] %v325_v54  ;;  %880 = vst [vmem:[%s2583_s1 + $0x340] sm:$0xff] %v293_v55 }
  0xba   :  { %438 = vxpose.xlu1.b32.cont [15/16] %v101_v56, 128  ;;  %v326_v58 = vpop.trf.xlu1  ;;  %406 = vxpose.xlu0.b32.cont [15/16] %v100_v57, 128  ;;  %v294_v59 = vpop.trf.xlu0  ;;  %v133_v56 = vld [vmem:[%s2582_s0 + $0x3e8] sm:$0xff]  ;;  %v132_v57 = vld [vmem:[%s2582_s0 + $0x3e0] sm:$0xff] }
  0xbb   :  { %1016 = vst [vmem:[%s2583_s1 + $0x780] sm:$0xff] %v326_v58  ;;  %888 = vst [vmem:[%s2583_s1 + $0x380] sm:$0xff] %v294_v59 }
  0xbe   :  { %439 = vxpose.xlu1.b32.end [16/16] %v103_v60, 128  ;;  %v327_v62 = vpop.trf.xlu1  ;;  %407 = vxpose.xlu0.b32.end [16/16] %v102_v61, 128  ;;  %v295_v63 = vpop.trf.xlu0  ;;  %v135_v60 = vld [vmem:[%s2582_s0 + $0x3f8] sm:$0xff]  ;;  %v134_v61 = vld [vmem:[%s2582_s0 + $0x3f0] sm:$0xff] }
  0xbf   :  { %1024 = vst [vmem:[%s2583_s1 + $0x7c0] sm:$0xff] %v327_v62  ;;  %896 = vst [vmem:[%s2583_s1 + $0x3c0] sm:$0xff] %v295_v63 }
  0xc2   :  { %488 = vxpose.xlu1.b32.start [1/16] %v105_v0, 128  ;;  %v376_v2 = vpop.trf.xlu1  ;;  %456 = vxpose.xlu0.b32.start [1/16] %v104_v1, 128  ;;  %v344_v3 = vpop.trf.xlu0  ;;  %v137_v0 = vld [vmem:[%s2582_s0 + $0x408] sm:$0xff]  ;;  %v136_v1 = vld [vmem:[%s2582_s0 + $0x400] sm:$0xff] }
  0xc3   :  { %905 = vst [vmem:[%s2583_s1 + $0x408] sm:$0xff] %v376_v2  ;;  %777 = vst [vmem:[%s2583_s1 + $0x8] sm:$0xff] %v344_v3 }
  0xc6   :  { %489 = vxpose.xlu1.b32.cont [2/16] %v107_v4, 128  ;;  %v377_v6 = vpop.trf.xlu1  ;;  %457 = vxpose.xlu0.b32.cont [2/16] %v106_v5, 128  ;;  %v345_v7 = vpop.trf.xlu0  ;;  %v139_v4 = vld [vmem:[%s2582_s0 + $0x418] sm:$0xff]  ;;  %v138_v5 = vld [vmem:[%s2582_s0 + $0x410] sm:$0xff] }
  0xc7   :  { %913 = vst [vmem:[%s2583_s1 + $0x448] sm:$0xff] %v377_v6  ;;  %785 = vst [vmem:[%s2583_s1 + $0x48] sm:$0xff] %v345_v7 }
  0xca   :  { %490 = vxpose.xlu1.b32.cont [3/16] %v109_v8, 128  ;;  %v378_v10 = vpop.trf.xlu1  ;;  %458 = vxpose.xlu0.b32.cont [3/16] %v108_v9, 128  ;;  %v346_v11 = vpop.trf.xlu0  ;;  %v141_v8 = vld [vmem:[%s2582_s0 + $0x428] sm:$0xff]  ;;  %v140_v9 = vld [vmem:[%s2582_s0 + $0x420] sm:$0xff] }
  0xcb   :  { %921 = vst [vmem:[%s2583_s1 + $0x488] sm:$0xff] %v378_v10  ;;  %793 = vst [vmem:[%s2583_s1 + $0x88] sm:$0xff] %v346_v11 }
  0xce   :  { %491 = vxpose.xlu1.b32.cont [4/16] %v111_v12, 128  ;;  %v379_v14 = vpop.trf.xlu1  ;;  %459 = vxpose.xlu0.b32.cont [4/16] %v110_v13, 128  ;;  %v347_v15 = vpop.trf.xlu0  ;;  %v143_v12 = vld [vmem:[%s2582_s0 + $0x438] sm:$0xff]  ;;  %v142_v13 = vld [vmem:[%s2582_s0 + $0x430] sm:$0xff] }
  0xcf   :  { %929 = vst [vmem:[%s2583_s1 + $0x4c8] sm:$0xff] %v379_v14  ;;  %801 = vst [vmem:[%s2583_s1 + $0xc8] sm:$0xff] %v347_v15 }
  0xd2   :  { %492 = vxpose.xlu1.b32.cont [5/16] %v113_v16, 128  ;;  %v380_v18 = vpop.trf.xlu1  ;;  %460 = vxpose.xlu0.b32.cont [5/16] %v112_v17, 128  ;;  %v348_v19 = vpop.trf.xlu0  ;;  %v145_v16 = vld [vmem:[%s2582_s0 + $0x448] sm:$0xff]  ;;  %v144_v17 = vld [vmem:[%s2582_s0 + $0x440] sm:$0xff] }
  0xd3   :  { %937 = vst [vmem:[%s2583_s1 + $0x508] sm:$0xff] %v380_v18  ;;  %809 = vst [vmem:[%s2583_s1 + $0x108] sm:$0xff] %v348_v19 }
  0xd6   :  { %493 = vxpose.xlu1.b32.cont [6/16] %v115_v20, 128  ;;  %v381_v22 = vpop.trf.xlu1  ;;  %461 = vxpose.xlu0.b32.cont [6/16] %v114_v21, 128  ;;  %v349_v23 = vpop.trf.xlu0  ;;  %v147_v20 = vld [vmem:[%s2582_s0 + $0x458] sm:$0xff]  ;;  %v146_v21 = vld [vmem:[%s2582_s0 + $0x450] sm:$0xff] }
  0xd7   :  { %945 = vst [vmem:[%s2583_s1 + $0x548] sm:$0xff] %v381_v22  ;;  %817 = vst [vmem:[%s2583_s1 + $0x148] sm:$0xff] %v349_v23 }
  0xda   :  { %494 = vxpose.xlu1.b32.cont [7/16] %v117_v24, 128  ;;  %v382_v26 = vpop.trf.xlu1  ;;  %462 = vxpose.xlu0.b32.cont [7/16] %v116_v25, 128  ;;  %v350_v27 = vpop.trf.xlu0  ;;  %v149_v24 = vld [vmem:[%s2582_s0 + $0x468] sm:$0xff]  ;;  %v148_v25 = vld [vmem:[%s2582_s0 + $0x460] sm:$0xff] }
  0xdb   :  { %953 = vst [vmem:[%s2583_s1 + $0x588] sm:$0xff] %v382_v26  ;;  %825 = vst [vmem:[%s2583_s1 + $0x188] sm:$0xff] %v350_v27 }
  0xde   :  { %495 = vxpose.xlu1.b32.cont [8/16] %v119_v28, 128  ;;  %v383_v30 = vpop.trf.xlu1  ;;  %463 = vxpose.xlu0.b32.cont [8/16] %v118_v29, 128  ;;  %v351_v31 = vpop.trf.xlu0  ;;  %v151_v28 = vld [vmem:[%s2582_s0 + $0x478] sm:$0xff]  ;;  %v150_v29 = vld [vmem:[%s2582_s0 + $0x470] sm:$0xff] }
  0xdf   :  { %961 = vst [vmem:[%s2583_s1 + $0x5c8] sm:$0xff] %v383_v30  ;;  %833 = vst [vmem:[%s2583_s1 + $0x1c8] sm:$0xff] %v351_v31 }
  0xe2   :  { %496 = vxpose.xlu1.b32.cont [9/16] %v121_v32, 128  ;;  %v384_v34 = vpop.trf.xlu1  ;;  %464 = vxpose.xlu0.b32.cont [9/16] %v120_v33, 128  ;;  %v352_v35 = vpop.trf.xlu0  ;;  %v153_v32 = vld [vmem:[%s2582_s0 + $0x488] sm:$0xff]  ;;  %v152_v33 = vld [vmem:[%s2582_s0 + $0x480] sm:$0xff] }
  0xe3   :  { %969 = vst [vmem:[%s2583_s1 + $0x608] sm:$0xff] %v384_v34  ;;  %841 = vst [vmem:[%s2583_s1 + $0x208] sm:$0xff] %v352_v35 }
  0xe6   :  { %497 = vxpose.xlu1.b32.cont [10/16] %v123_v36, 128  ;;  %v385_v38 = vpop.trf.xlu1  ;;  %465 = vxpose.xlu0.b32.cont [10/16] %v122_v37, 128  ;;  %v353_v39 = vpop.trf.xlu0  ;;  %v155_v36 = vld [vmem:[%s2582_s0 + $0x498] sm:$0xff]  ;;  %v154_v37 = vld [vmem:[%s2582_s0 + $0x490] sm:$0xff] }
  0xe7   :  { %977 = vst [vmem:[%s2583_s1 + $0x648] sm:$0xff] %v385_v38  ;;  %849 = vst [vmem:[%s2583_s1 + $0x248] sm:$0xff] %v353_v39 }
  0xea   :  { %498 = vxpose.xlu1.b32.cont [11/16] %v125_v40, 128  ;;  %v386_v42 = vpop.trf.xlu1  ;;  %466 = vxpose.xlu0.b32.cont [11/16] %v124_v41, 128  ;;  %v354_v43 = vpop.trf.xlu0  ;;  %v157_v40 = vld [vmem:[%s2582_s0 + $0x4a8] sm:$0xff]  ;;  %v156_v41 = vld [vmem:[%s2582_s0 + $0x4a0] sm:$0xff] }
  0xeb   :  { %985 = vst [vmem:[%s2583_s1 + $0x688] sm:$0xff] %v386_v42  ;;  %857 = vst [vmem:[%s2583_s1 + $0x288] sm:$0xff] %v354_v43 }
  0xee   :  { %499 = vxpose.xlu1.b32.cont [12/16] %v127_v44, 128  ;;  %v387_v46 = vpop.trf.xlu1  ;;  %467 = vxpose.xlu0.b32.cont [12/16] %v126_v45, 128  ;;  %v355_v47 = vpop.trf.xlu0  ;;  %v159_v44 = vld [vmem:[%s2582_s0 + $0x4b8] sm:$0xff]  ;;  %v158_v45 = vld [vmem:[%s2582_s0 + $0x4b0] sm:$0xff] }
  0xef   :  { %993 = vst [vmem:[%s2583_s1 + $0x6c8] sm:$0xff] %v387_v46  ;;  %865 = vst [vmem:[%s2583_s1 + $0x2c8] sm:$0xff] %v355_v47 }
  0xf2   :  { %500 = vxpose.xlu1.b32.cont [13/16] %v129_v48, 128  ;;  %v388_v50 = vpop.trf.xlu1  ;;  %468 = vxpose.xlu0.b32.cont [13/16] %v128_v49, 128  ;;  %v356_v51 = vpop.trf.xlu0  ;;  %v161_v48 = vld [vmem:[%s2582_s0 + $0x4c8] sm:$0xff]  ;;  %v160_v49 = vld [vmem:[%s2582_s0 + $0x4c0] sm:$0xff] }
  0xf3   :  { %1001 = vst [vmem:[%s2583_s1 + $0x708] sm:$0xff] %v388_v50  ;;  %873 = vst [vmem:[%s2583_s1 + $0x308] sm:$0xff] %v356_v51 }
  0xf6   :  { %501 = vxpose.xlu1.b32.cont [14/16] %v131_v52, 128  ;;  %v389_v54 = vpop.trf.xlu1  ;;  %469 = vxpose.xlu0.b32.cont [14/16] %v130_v53, 128  ;;  %v357_v55 = vpop.trf.xlu0  ;;  %v163_v52 = vld [vmem:[%s2582_s0 + $0x4d8] sm:$0xff]  ;;  %v162_v53 = vld [vmem:[%s2582_s0 + $0x4d0] sm:$0xff] }
  0xf7   :  { %1009 = vst [vmem:[%s2583_s1 + $0x748] sm:$0xff] %v389_v54  ;;  %881 = vst [vmem:[%s2583_s1 + $0x348] sm:$0xff] %v357_v55 }
  0xfa   :  { %502 = vxpose.xlu1.b32.cont [15/16] %v133_v56, 128  ;;  %v390_v58 = vpop.trf.xlu1  ;;  %470 = vxpose.xlu0.b32.cont [15/16] %v132_v57, 128  ;;  %v358_v59 = vpop.trf.xlu0  ;;  %v165_v56 = vld [vmem:[%s2582_s0 + $0x4e8] sm:$0xff]  ;;  %v164_v57 = vld [vmem:[%s2582_s0 + $0x4e0] sm:$0xff] }
  0xfb   :  { %1017 = vst [vmem:[%s2583_s1 + $0x788] sm:$0xff] %v390_v58  ;;  %889 = vst [vmem:[%s2583_s1 + $0x388] sm:$0xff] %v358_v59 }
  0xfe   :  { %503 = vxpose.xlu1.b32.end [16/16] %v135_v60, 128  ;;  %v391_v62 = vpop.trf.xlu1  ;;  %471 = vxpose.xlu0.b32.end [16/16] %v134_v61, 128  ;;  %v359_v63 = vpop.trf.xlu0  ;;  %v167_v60 = vld [vmem:[%s2582_s0 + $0x4f8] sm:$0xff]  ;;  %v166_v61 = vld [vmem:[%s2582_s0 + $0x4f0] sm:$0xff] }
  0xff   :  { %1025 = vst [vmem:[%s2583_s1 + $0x7c8] sm:$0xff] %v391_v62  ;;  %897 = vst [vmem:[%s2583_s1 + $0x3c8] sm:$0xff] %v359_v63 }
 0x102   :  { %552 = vxpose.xlu1.b32.start [1/16] %v137_v0, 128  ;;  %v440_v2 = vpop.trf.xlu1  ;;  %520 = vxpose.xlu0.b32.start [1/16] %v136_v1, 128  ;;  %v408_v3 = vpop.trf.xlu0  ;;  %v169_v0 = vld [vmem:[%s2582_s0 + $0x508] sm:$0xff]  ;;  %v168_v1 = vld [vmem:[%s2582_s0 + $0x500] sm:$0xff] }
 0x103   :  { %906 = vst [vmem:[%s2583_s1 + $0x410] sm:$0xff] %v440_v2  ;;  %778 = vst [vmem:[%s2583_s1 + $0x10] sm:$0xff] %v408_v3 }
 0x106   :  { %553 = vxpose.xlu1.b32.cont [2/16] %v139_v4, 128  ;;  %v441_v6 = vpop.trf.xlu1  ;;  %521 = vxpose.xlu0.b32.cont [2/16] %v138_v5, 128  ;;  %v409_v7 = vpop.trf.xlu0  ;;  %v171_v4 = vld [vmem:[%s2582_s0 + $0x518] sm:$0xff]  ;;  %v170_v5 = vld [vmem:[%s2582_s0 + $0x510] sm:$0xff] }
 0x107   :  { %914 = vst [vmem:[%s2583_s1 + $0x450] sm:$0xff] %v441_v6  ;;  %786 = vst [vmem:[%s2583_s1 + $0x50] sm:$0xff] %v409_v7 }
 0x10a   :  { %554 = vxpose.xlu1.b32.cont [3/16] %v141_v8, 128  ;;  %v442_v10 = vpop.trf.xlu1  ;;  %522 = vxpose.xlu0.b32.cont [3/16] %v140_v9, 128  ;;  %v410_v11 = vpop.trf.xlu0  ;;  %v173_v8 = vld [vmem:[%s2582_s0 + $0x528] sm:$0xff]  ;;  %v172_v9 = vld [vmem:[%s2582_s0 + $0x520] sm:$0xff] }
 0x10b   :  { %922 = vst [vmem:[%s2583_s1 + $0x490] sm:$0xff] %v442_v10  ;;  %794 = vst [vmem:[%s2583_s1 + $0x90] sm:$0xff] %v410_v11 }
 0x10e   :  { %555 = vxpose.xlu1.b32.cont [4/16] %v143_v12, 128  ;;  %v443_v14 = vpop.trf.xlu1  ;;  %523 = vxpose.xlu0.b32.cont [4/16] %v142_v13, 128  ;;  %v411_v15 = vpop.trf.xlu0  ;;  %v175_v12 = vld [vmem:[%s2582_s0 + $0x538] sm:$0xff]  ;;  %v174_v13 = vld [vmem:[%s2582_s0 + $0x530] sm:$0xff] }
 0x10f   :  { %930 = vst [vmem:[%s2583_s1 + $0x4d0] sm:$0xff] %v443_v14  ;;  %802 = vst [vmem:[%s2583_s1 + $0xd0] sm:$0xff] %v411_v15 }
 0x112   :  { %556 = vxpose.xlu1.b32.cont [5/16] %v145_v16, 128  ;;  %v444_v18 = vpop.trf.xlu1  ;;  %524 = vxpose.xlu0.b32.cont [5/16] %v144_v17, 128  ;;  %v412_v19 = vpop.trf.xlu0  ;;  %v177_v16 = vld [vmem:[%s2582_s0 + $0x548] sm:$0xff]  ;;  %v176_v17 = vld [vmem:[%s2582_s0 + $0x540] sm:$0xff] }
 0x113   :  { %938 = vst [vmem:[%s2583_s1 + $0x510] sm:$0xff] %v444_v18  ;;  %810 = vst [vmem:[%s2583_s1 + $0x110] sm:$0xff] %v412_v19 }
 0x116   :  { %557 = vxpose.xlu1.b32.cont [6/16] %v147_v20, 128  ;;  %v445_v22 = vpop.trf.xlu1  ;;  %525 = vxpose.xlu0.b32.cont [6/16] %v146_v21, 128  ;;  %v413_v23 = vpop.trf.xlu0  ;;  %v179_v20 = vld [vmem:[%s2582_s0 + $0x558] sm:$0xff]  ;;  %v178_v21 = vld [vmem:[%s2582_s0 + $0x550] sm:$0xff] }
 0x117   :  { %946 = vst [vmem:[%s2583_s1 + $0x550] sm:$0xff] %v445_v22  ;;  %818 = vst [vmem:[%s2583_s1 + $0x150] sm:$0xff] %v413_v23 }
 0x11a   :  { %558 = vxpose.xlu1.b32.cont [7/16] %v149_v24, 128  ;;  %v446_v26 = vpop.trf.xlu1  ;;  %526 = vxpose.xlu0.b32.cont [7/16] %v148_v25, 128  ;;  %v414_v27 = vpop.trf.xlu0  ;;  %v181_v24 = vld [vmem:[%s2582_s0 + $0x568] sm:$0xff]  ;;  %v180_v25 = vld [vmem:[%s2582_s0 + $0x560] sm:$0xff] }
 0x11b   :  { %954 = vst [vmem:[%s2583_s1 + $0x590] sm:$0xff] %v446_v26  ;;  %826 = vst [vmem:[%s2583_s1 + $0x190] sm:$0xff] %v414_v27 }
 0x11e   :  { %559 = vxpose.xlu1.b32.cont [8/16] %v151_v28, 128  ;;  %v447_v30 = vpop.trf.xlu1  ;;  %527 = vxpose.xlu0.b32.cont [8/16] %v150_v29, 128  ;;  %v415_v31 = vpop.trf.xlu0  ;;  %v183_v28 = vld [vmem:[%s2582_s0 + $0x578] sm:$0xff]  ;;  %v182_v29 = vld [vmem:[%s2582_s0 + $0x570] sm:$0xff] }
 0x11f   :  { %962 = vst [vmem:[%s2583_s1 + $0x5d0] sm:$0xff] %v447_v30  ;;  %834 = vst [vmem:[%s2583_s1 + $0x1d0] sm:$0xff] %v415_v31 }
 0x122   :  { %560 = vxpose.xlu1.b32.cont [9/16] %v153_v32, 128  ;;  %v448_v34 = vpop.trf.xlu1  ;;  %528 = vxpose.xlu0.b32.cont [9/16] %v152_v33, 128  ;;  %v416_v35 = vpop.trf.xlu0  ;;  %v185_v32 = vld [vmem:[%s2582_s0 + $0x588] sm:$0xff]  ;;  %v184_v33 = vld [vmem:[%s2582_s0 + $0x580] sm:$0xff] }
 0x123   :  { %970 = vst [vmem:[%s2583_s1 + $0x610] sm:$0xff] %v448_v34  ;;  %842 = vst [vmem:[%s2583_s1 + $0x210] sm:$0xff] %v416_v35 }
 0x126   :  { %561 = vxpose.xlu1.b32.cont [10/16] %v155_v36, 128  ;;  %v449_v38 = vpop.trf.xlu1  ;;  %529 = vxpose.xlu0.b32.cont [10/16] %v154_v37, 128  ;;  %v417_v39 = vpop.trf.xlu0  ;;  %v187_v36 = vld [vmem:[%s2582_s0 + $0x598] sm:$0xff]  ;;  %v186_v37 = vld [vmem:[%s2582_s0 + $0x590] sm:$0xff] }
 0x127   :  { %978 = vst [vmem:[%s2583_s1 + $0x650] sm:$0xff] %v449_v38  ;;  %850 = vst [vmem:[%s2583_s1 + $0x250] sm:$0xff] %v417_v39 }
 0x12a   :  { %562 = vxpose.xlu1.b32.cont [11/16] %v157_v40, 128  ;;  %v450_v42 = vpop.trf.xlu1  ;;  %530 = vxpose.xlu0.b32.cont [11/16] %v156_v41, 128  ;;  %v418_v43 = vpop.trf.xlu0  ;;  %v189_v40 = vld [vmem:[%s2582_s0 + $0x5a8] sm:$0xff]  ;;  %v188_v41 = vld [vmem:[%s2582_s0 + $0x5a0] sm:$0xff] }
 0x12b   :  { %986 = vst [vmem:[%s2583_s1 + $0x690] sm:$0xff] %v450_v42  ;;  %858 = vst [vmem:[%s2583_s1 + $0x290] sm:$0xff] %v418_v43 }
 0x12e   :  { %563 = vxpose.xlu1.b32.cont [12/16] %v159_v44, 128  ;;  %v451_v46 = vpop.trf.xlu1  ;;  %531 = vxpose.xlu0.b32.cont [12/16] %v158_v45, 128  ;;  %v419_v47 = vpop.trf.xlu0  ;;  %v191_v44 = vld [vmem:[%s2582_s0 + $0x5b8] sm:$0xff]  ;;  %v190_v45 = vld [vmem:[%s2582_s0 + $0x5b0] sm:$0xff] }
 0x12f   :  { %994 = vst [vmem:[%s2583_s1 + $0x6d0] sm:$0xff] %v451_v46  ;;  %866 = vst [vmem:[%s2583_s1 + $0x2d0] sm:$0xff] %v419_v47 }
 0x132   :  { %564 = vxpose.xlu1.b32.cont [13/16] %v161_v48, 128  ;;  %v452_v50 = vpop.trf.xlu1  ;;  %532 = vxpose.xlu0.b32.cont [13/16] %v160_v49, 128  ;;  %v420_v51 = vpop.trf.xlu0  ;;  %v193_v48 = vld [vmem:[%s2582_s0 + $0x5c8] sm:$0xff]  ;;  %v192_v49 = vld [vmem:[%s2582_s0 + $0x5c0] sm:$0xff] }
 0x133   :  { %1002 = vst [vmem:[%s2583_s1 + $0x710] sm:$0xff] %v452_v50  ;;  %874 = vst [vmem:[%s2583_s1 + $0x310] sm:$0xff] %v420_v51 }
 0x136   :  { %565 = vxpose.xlu1.b32.cont [14/16] %v163_v52, 128  ;;  %v453_v54 = vpop.trf.xlu1  ;;  %533 = vxpose.xlu0.b32.cont [14/16] %v162_v53, 128  ;;  %v421_v55 = vpop.trf.xlu0  ;;  %v195_v52 = vld [vmem:[%s2582_s0 + $0x5d8] sm:$0xff]  ;;  %v194_v53 = vld [vmem:[%s2582_s0 + $0x5d0] sm:$0xff] }
 0x137   :  { %1010 = vst [vmem:[%s2583_s1 + $0x750] sm:$0xff] %v453_v54  ;;  %882 = vst [vmem:[%s2583_s1 + $0x350] sm:$0xff] %v421_v55 }
 0x13a   :  { %566 = vxpose.xlu1.b32.cont [15/16] %v165_v56, 128  ;;  %v454_v58 = vpop.trf.xlu1  ;;  %534 = vxpose.xlu0.b32.cont [15/16] %v164_v57, 128  ;;  %v422_v59 = vpop.trf.xlu0  ;;  %v197_v56 = vld [vmem:[%s2582_s0 + $0x5e8] sm:$0xff]  ;;  %v196_v57 = vld [vmem:[%s2582_s0 + $0x5e0] sm:$0xff] }
 0x13b   :  { %1018 = vst [vmem:[%s2583_s1 + $0x790] sm:$0xff] %v454_v58  ;;  %890 = vst [vmem:[%s2583_s1 + $0x390] sm:$0xff] %v422_v59 }
 0x13e   :  { %567 = vxpose.xlu1.b32.end [16/16] %v167_v60, 128  ;;  %v455_v62 = vpop.trf.xlu1  ;;  %535 = vxpose.xlu0.b32.end [16/16] %v166_v61, 128  ;;  %v423_v63 = vpop.trf.xlu0  ;;  %v199_v60 = vld [vmem:[%s2582_s0 + $0x5f8] sm:$0xff]  ;;  %v198_v61 = vld [vmem:[%s2582_s0 + $0x5f0] sm:$0xff] }
 0x13f   :  { %1026 = vst [vmem:[%s2583_s1 + $0x7d0] sm:$0xff] %v455_v62  ;;  %898 = vst [vmem:[%s2583_s1 + $0x3d0] sm:$0xff] %v423_v63 }
 0x142   :  { %616 = vxpose.xlu1.b32.start [1/16] %v169_v0, 128  ;;  %v504_v2 = vpop.trf.xlu1  ;;  %584 = vxpose.xlu0.b32.start [1/16] %v168_v1, 128  ;;  %v472_v3 = vpop.trf.xlu0  ;;  %v201_v0 = vld [vmem:[%s2582_s0 + $0x608] sm:$0xff]  ;;  %v200_v1 = vld [vmem:[%s2582_s0 + $0x600] sm:$0xff] }
 0x143   :  { %907 = vst [vmem:[%s2583_s1 + $0x418] sm:$0xff] %v504_v2  ;;  %779 = vst [vmem:[%s2583_s1 + $0x18] sm:$0xff] %v472_v3 }
 0x146   :  { %617 = vxpose.xlu1.b32.cont [2/16] %v171_v4, 128  ;;  %v505_v6 = vpop.trf.xlu1  ;;  %585 = vxpose.xlu0.b32.cont [2/16] %v170_v5, 128  ;;  %v473_v7 = vpop.trf.xlu0  ;;  %v203_v4 = vld [vmem:[%s2582_s0 + $0x618] sm:$0xff]  ;;  %v202_v5 = vld [vmem:[%s2582_s0 + $0x610] sm:$0xff] }
 0x147   :  { %915 = vst [vmem:[%s2583_s1 + $0x458] sm:$0xff] %v505_v6  ;;  %787 = vst [vmem:[%s2583_s1 + $0x58] sm:$0xff] %v473_v7 }
 0x14a   :  { %618 = vxpose.xlu1.b32.cont [3/16] %v173_v8, 128  ;;  %v506_v10 = vpop.trf.xlu1  ;;  %586 = vxpose.xlu0.b32.cont [3/16] %v172_v9, 128  ;;  %v474_v11 = vpop.trf.xlu0  ;;  %v205_v8 = vld [vmem:[%s2582_s0 + $0x628] sm:$0xff]  ;;  %v204_v9 = vld [vmem:[%s2582_s0 + $0x620] sm:$0xff] }
 0x14b   :  { %923 = vst [vmem:[%s2583_s1 + $0x498] sm:$0xff] %v506_v10  ;;  %795 = vst [vmem:[%s2583_s1 + $0x98] sm:$0xff] %v474_v11 }
 0x14e   :  { %619 = vxpose.xlu1.b32.cont [4/16] %v175_v12, 128  ;;  %v507_v14 = vpop.trf.xlu1  ;;  %587 = vxpose.xlu0.b32.cont [4/16] %v174_v13, 128  ;;  %v475_v15 = vpop.trf.xlu0  ;;  %v207_v12 = vld [vmem:[%s2582_s0 + $0x638] sm:$0xff]  ;;  %v206_v13 = vld [vmem:[%s2582_s0 + $0x630] sm:$0xff] }
 0x14f   :  { %931 = vst [vmem:[%s2583_s1 + $0x4d8] sm:$0xff] %v507_v14  ;;  %803 = vst [vmem:[%s2583_s1 + $0xd8] sm:$0xff] %v475_v15 }
 0x152   :  { %620 = vxpose.xlu1.b32.cont [5/16] %v177_v16, 128  ;;  %v508_v18 = vpop.trf.xlu1  ;;  %588 = vxpose.xlu0.b32.cont [5/16] %v176_v17, 128  ;;  %v476_v19 = vpop.trf.xlu0  ;;  %v209_v16 = vld [vmem:[%s2582_s0 + $0x648] sm:$0xff]  ;;  %v208_v17 = vld [vmem:[%s2582_s0 + $0x640] sm:$0xff] }
 0x153   :  { %939 = vst [vmem:[%s2583_s1 + $0x518] sm:$0xff] %v508_v18  ;;  %811 = vst [vmem:[%s2583_s1 + $0x118] sm:$0xff] %v476_v19 }
 0x156   :  { %621 = vxpose.xlu1.b32.cont [6/16] %v179_v20, 128  ;;  %v509_v22 = vpop.trf.xlu1  ;;  %589 = vxpose.xlu0.b32.cont [6/16] %v178_v21, 128  ;;  %v477_v23 = vpop.trf.xlu0  ;;  %v211_v20 = vld [vmem:[%s2582_s0 + $0x658] sm:$0xff]  ;;  %v210_v21 = vld [vmem:[%s2582_s0 + $0x650] sm:$0xff] }
 0x157   :  { %947 = vst [vmem:[%s2583_s1 + $0x558] sm:$0xff] %v509_v22  ;;  %819 = vst [vmem:[%s2583_s1 + $0x158] sm:$0xff] %v477_v23 }
 0x15a   :  { %622 = vxpose.xlu1.b32.cont [7/16] %v181_v24, 128  ;;  %v510_v26 = vpop.trf.xlu1  ;;  %590 = vxpose.xlu0.b32.cont [7/16] %v180_v25, 128  ;;  %v478_v27 = vpop.trf.xlu0  ;;  %v213_v24 = vld [vmem:[%s2582_s0 + $0x668] sm:$0xff]  ;;  %v212_v25 = vld [vmem:[%s2582_s0 + $0x660] sm:$0xff] }
 0x15b   :  { %955 = vst [vmem:[%s2583_s1 + $0x598] sm:$0xff] %v510_v26  ;;  %827 = vst [vmem:[%s2583_s1 + $0x198] sm:$0xff] %v478_v27 }
 0x15e   :  { %623 = vxpose.xlu1.b32.cont [8/16] %v183_v28, 128  ;;  %v511_v30 = vpop.trf.xlu1  ;;  %591 = vxpose.xlu0.b32.cont [8/16] %v182_v29, 128  ;;  %v479_v31 = vpop.trf.xlu0  ;;  %v215_v28 = vld [vmem:[%s2582_s0 + $0x678] sm:$0xff]  ;;  %v214_v29 = vld [vmem:[%s2582_s0 + $0x670] sm:$0xff] }
 0x15f   :  { %963 = vst [vmem:[%s2583_s1 + $0x5d8] sm:$0xff] %v511_v30  ;;  %835 = vst [vmem:[%s2583_s1 + $0x1d8] sm:$0xff] %v479_v31 }
 0x162   :  { %624 = vxpose.xlu1.b32.cont [9/16] %v185_v32, 128  ;;  %v512_v34 = vpop.trf.xlu1  ;;  %592 = vxpose.xlu0.b32.cont [9/16] %v184_v33, 128  ;;  %v480_v35 = vpop.trf.xlu0  ;;  %v217_v32 = vld [vmem:[%s2582_s0 + $0x688] sm:$0xff]  ;;  %v216_v33 = vld [vmem:[%s2582_s0 + $0x680] sm:$0xff] }
 0x163   :  { %971 = vst [vmem:[%s2583_s1 + $0x618] sm:$0xff] %v512_v34  ;;  %843 = vst [vmem:[%s2583_s1 + $0x218] sm:$0xff] %v480_v35 }
 0x166   :  { %625 = vxpose.xlu1.b32.cont [10/16] %v187_v36, 128  ;;  %v513_v38 = vpop.trf.xlu1  ;;  %593 = vxpose.xlu0.b32.cont [10/16] %v186_v37, 128  ;;  %v481_v39 = vpop.trf.xlu0  ;;  %v219_v36 = vld [vmem:[%s2582_s0 + $0x698] sm:$0xff]  ;;  %v218_v37 = vld [vmem:[%s2582_s0 + $0x690] sm:$0xff] }
 0x167   :  { %979 = vst [vmem:[%s2583_s1 + $0x658] sm:$0xff] %v513_v38  ;;  %851 = vst [vmem:[%s2583_s1 + $0x258] sm:$0xff] %v481_v39 }
 0x16a   :  { %626 = vxpose.xlu1.b32.cont [11/16] %v189_v40, 128  ;;  %v514_v42 = vpop.trf.xlu1  ;;  %594 = vxpose.xlu0.b32.cont [11/16] %v188_v41, 128  ;;  %v482_v43 = vpop.trf.xlu0  ;;  %v221_v40 = vld [vmem:[%s2582_s0 + $0x6a8] sm:$0xff]  ;;  %v220_v41 = vld [vmem:[%s2582_s0 + $0x6a0] sm:$0xff] }
 0x16b   :  { %987 = vst [vmem:[%s2583_s1 + $0x698] sm:$0xff] %v514_v42  ;;  %859 = vst [vmem:[%s2583_s1 + $0x298] sm:$0xff] %v482_v43 }
 0x16e   :  { %627 = vxpose.xlu1.b32.cont [12/16] %v191_v44, 128  ;;  %v515_v46 = vpop.trf.xlu1  ;;  %595 = vxpose.xlu0.b32.cont [12/16] %v190_v45, 128  ;;  %v483_v47 = vpop.trf.xlu0  ;;  %v223_v44 = vld [vmem:[%s2582_s0 + $0x6b8] sm:$0xff]  ;;  %v222_v45 = vld [vmem:[%s2582_s0 + $0x6b0] sm:$0xff] }
 0x16f   :  { %995 = vst [vmem:[%s2583_s1 + $0x6d8] sm:$0xff] %v515_v46  ;;  %867 = vst [vmem:[%s2583_s1 + $0x2d8] sm:$0xff] %v483_v47 }
 0x172   :  { %628 = vxpose.xlu1.b32.cont [13/16] %v193_v48, 128  ;;  %v516_v50 = vpop.trf.xlu1  ;;  %596 = vxpose.xlu0.b32.cont [13/16] %v192_v49, 128  ;;  %v484_v51 = vpop.trf.xlu0  ;;  %v225_v48 = vld [vmem:[%s2582_s0 + $0x6c8] sm:$0xff]  ;;  %v224_v49 = vld [vmem:[%s2582_s0 + $0x6c0] sm:$0xff] }
 0x173   :  { %1003 = vst [vmem:[%s2583_s1 + $0x718] sm:$0xff] %v516_v50  ;;  %875 = vst [vmem:[%s2583_s1 + $0x318] sm:$0xff] %v484_v51 }
 0x176   :  { %629 = vxpose.xlu1.b32.cont [14/16] %v195_v52, 128  ;;  %v517_v54 = vpop.trf.xlu1  ;;  %597 = vxpose.xlu0.b32.cont [14/16] %v194_v53, 128  ;;  %v485_v55 = vpop.trf.xlu0  ;;  %v227_v52 = vld [vmem:[%s2582_s0 + $0x6d8] sm:$0xff]  ;;  %v226_v53 = vld [vmem:[%s2582_s0 + $0x6d0] sm:$0xff] }
 0x177   :  { %1011 = vst [vmem:[%s2583_s1 + $0x758] sm:$0xff] %v517_v54  ;;  %883 = vst [vmem:[%s2583_s1 + $0x358] sm:$0xff] %v485_v55 }
 0x17a   :  { %630 = vxpose.xlu1.b32.cont [15/16] %v197_v56, 128  ;;  %v518_v58 = vpop.trf.xlu1  ;;  %598 = vxpose.xlu0.b32.cont [15/16] %v196_v57, 128  ;;  %v486_v59 = vpop.trf.xlu0  ;;  %v229_v56 = vld [vmem:[%s2582_s0 + $0x6e8] sm:$0xff]  ;;  %v228_v57 = vld [vmem:[%s2582_s0 + $0x6e0] sm:$0xff] }
 0x17b   :  { %1019 = vst [vmem:[%s2583_s1 + $0x798] sm:$0xff] %v518_v58  ;;  %891 = vst [vmem:[%s2583_s1 + $0x398] sm:$0xff] %v486_v59 }
 0x17e   :  { %631 = vxpose.xlu1.b32.end [16/16] %v199_v60, 128  ;;  %v519_v62 = vpop.trf.xlu1  ;;  %599 = vxpose.xlu0.b32.end [16/16] %v198_v61, 128  ;;  %v487_v63 = vpop.trf.xlu0  ;;  %v231_v60 = vld [vmem:[%s2582_s0 + $0x6f8] sm:$0xff]  ;;  %v230_v61 = vld [vmem:[%s2582_s0 + $0x6f0] sm:$0xff] }
 0x17f   :  { %1027 = vst [vmem:[%s2583_s1 + $0x7d8] sm:$0xff] %v519_v62  ;;  %899 = vst [vmem:[%s2583_s1 + $0x3d8] sm:$0xff] %v487_v63 }
 0x182   :  { %680 = vxpose.xlu1.b32.start [1/16] %v201_v0, 128  ;;  %v568_v2 = vpop.trf.xlu1  ;;  %648 = vxpose.xlu0.b32.start [1/16] %v200_v1, 128  ;;  %v536_v3 = vpop.trf.xlu0  ;;  %v233_v0 = vld [vmem:[%s2582_s0 + $0x708] sm:$0xff]  ;;  %v232_v1 = vld [vmem:[%s2582_s0 + $0x700] sm:$0xff] }
 0x183   :  { %908 = vst [vmem:[%s2583_s1 + $0x420] sm:$0xff] %v568_v2  ;;  %780 = vst [vmem:[%s2583_s1 + $0x20] sm:$0xff] %v536_v3 }
 0x186   :  { %681 = vxpose.xlu1.b32.cont [2/16] %v203_v4, 128  ;;  %v569_v6 = vpop.trf.xlu1  ;;  %649 = vxpose.xlu0.b32.cont [2/16] %v202_v5, 128  ;;  %v537_v7 = vpop.trf.xlu0  ;;  %v235_v4 = vld [vmem:[%s2582_s0 + $0x718] sm:$0xff]  ;;  %v234_v5 = vld [vmem:[%s2582_s0 + $0x710] sm:$0xff] }
 0x187   :  { %916 = vst [vmem:[%s2583_s1 + $0x460] sm:$0xff] %v569_v6  ;;  %788 = vst [vmem:[%s2583_s1 + $0x60] sm:$0xff] %v537_v7 }
 0x18a   :  { %682 = vxpose.xlu1.b32.cont [3/16] %v205_v8, 128  ;;  %v570_v10 = vpop.trf.xlu1  ;;  %650 = vxpose.xlu0.b32.cont [3/16] %v204_v9, 128  ;;  %v538_v11 = vpop.trf.xlu0  ;;  %v237_v8 = vld [vmem:[%s2582_s0 + $0x728] sm:$0xff]  ;;  %v236_v9 = vld [vmem:[%s2582_s0 + $0x720] sm:$0xff] }
 0x18b   :  { %924 = vst [vmem:[%s2583_s1 + $0x4a0] sm:$0xff] %v570_v10  ;;  %796 = vst [vmem:[%s2583_s1 + $0xa0] sm:$0xff] %v538_v11 }
 0x18e   :  { %683 = vxpose.xlu1.b32.cont [4/16] %v207_v12, 128  ;;  %v571_v14 = vpop.trf.xlu1  ;;  %651 = vxpose.xlu0.b32.cont [4/16] %v206_v13, 128  ;;  %v539_v15 = vpop.trf.xlu0  ;;  %v239_v12 = vld [vmem:[%s2582_s0 + $0x738] sm:$0xff]  ;;  %v238_v13 = vld [vmem:[%s2582_s0 + $0x730] sm:$0xff] }
 0x18f   :  { %932 = vst [vmem:[%s2583_s1 + $0x4e0] sm:$0xff] %v571_v14  ;;  %804 = vst [vmem:[%s2583_s1 + $0xe0] sm:$0xff] %v539_v15 }
 0x192   :  { %684 = vxpose.xlu1.b32.cont [5/16] %v209_v16, 128  ;;  %v572_v18 = vpop.trf.xlu1  ;;  %652 = vxpose.xlu0.b32.cont [5/16] %v208_v17, 128  ;;  %v540_v19 = vpop.trf.xlu0  ;;  %v241_v16 = vld [vmem:[%s2582_s0 + $0x748] sm:$0xff]  ;;  %v240_v17 = vld [vmem:[%s2582_s0 + $0x740] sm:$0xff] }
 0x193   :  { %940 = vst [vmem:[%s2583_s1 + $0x520] sm:$0xff] %v572_v18  ;;  %812 = vst [vmem:[%s2583_s1 + $0x120] sm:$0xff] %v540_v19 }
 0x196   :  { %685 = vxpose.xlu1.b32.cont [6/16] %v211_v20, 128  ;;  %v573_v22 = vpop.trf.xlu1  ;;  %653 = vxpose.xlu0.b32.cont [6/16] %v210_v21, 128  ;;  %v541_v23 = vpop.trf.xlu0  ;;  %v243_v20 = vld [vmem:[%s2582_s0 + $0x758] sm:$0xff]  ;;  %v242_v21 = vld [vmem:[%s2582_s0 + $0x750] sm:$0xff] }
 0x197   :  { %948 = vst [vmem:[%s2583_s1 + $0x560] sm:$0xff] %v573_v22  ;;  %820 = vst [vmem:[%s2583_s1 + $0x160] sm:$0xff] %v541_v23 }
 0x19a   :  { %686 = vxpose.xlu1.b32.cont [7/16] %v213_v24, 128  ;;  %v574_v26 = vpop.trf.xlu1  ;;  %654 = vxpose.xlu0.b32.cont [7/16] %v212_v25, 128  ;;  %v542_v27 = vpop.trf.xlu0  ;;  %v245_v24 = vld [vmem:[%s2582_s0 + $0x768] sm:$0xff]  ;;  %v244_v25 = vld [vmem:[%s2582_s0 + $0x760] sm:$0xff] }
 0x19b   :  { %956 = vst [vmem:[%s2583_s1 + $0x5a0] sm:$0xff] %v574_v26  ;;  %828 = vst [vmem:[%s2583_s1 + $0x1a0] sm:$0xff] %v542_v27 }
 0x19e   :  { %687 = vxpose.xlu1.b32.cont [8/16] %v215_v28, 128  ;;  %v575_v30 = vpop.trf.xlu1  ;;  %655 = vxpose.xlu0.b32.cont [8/16] %v214_v29, 128  ;;  %v543_v31 = vpop.trf.xlu0  ;;  %v247_v28 = vld [vmem:[%s2582_s0 + $0x778] sm:$0xff]  ;;  %v246_v29 = vld [vmem:[%s2582_s0 + $0x770] sm:$0xff] }
 0x19f   :  { %964 = vst [vmem:[%s2583_s1 + $0x5e0] sm:$0xff] %v575_v30  ;;  %836 = vst [vmem:[%s2583_s1 + $0x1e0] sm:$0xff] %v543_v31 }
 0x1a2   :  { %688 = vxpose.xlu1.b32.cont [9/16] %v217_v32, 128  ;;  %v576_v34 = vpop.trf.xlu1  ;;  %656 = vxpose.xlu0.b32.cont [9/16] %v216_v33, 128  ;;  %v544_v35 = vpop.trf.xlu0  ;;  %v249_v32 = vld [vmem:[%s2582_s0 + $0x788] sm:$0xff]  ;;  %v248_v33 = vld [vmem:[%s2582_s0 + $0x780] sm:$0xff] }
 0x1a3   :  { %972 = vst [vmem:[%s2583_s1 + $0x620] sm:$0xff] %v576_v34  ;;  %844 = vst [vmem:[%s2583_s1 + $0x220] sm:$0xff] %v544_v35 }
 0x1a6   :  { %689 = vxpose.xlu1.b32.cont [10/16] %v219_v36, 128  ;;  %v577_v38 = vpop.trf.xlu1  ;;  %657 = vxpose.xlu0.b32.cont [10/16] %v218_v37, 128  ;;  %v545_v39 = vpop.trf.xlu0  ;;  %v251_v36 = vld [vmem:[%s2582_s0 + $0x798] sm:$0xff]  ;;  %v250_v37 = vld [vmem:[%s2582_s0 + $0x790] sm:$0xff] }
 0x1a7   :  { %980 = vst [vmem:[%s2583_s1 + $0x660] sm:$0xff] %v577_v38  ;;  %852 = vst [vmem:[%s2583_s1 + $0x260] sm:$0xff] %v545_v39 }
 0x1aa   :  { %690 = vxpose.xlu1.b32.cont [11/16] %v221_v40, 128  ;;  %v578_v42 = vpop.trf.xlu1  ;;  %658 = vxpose.xlu0.b32.cont [11/16] %v220_v41, 128  ;;  %v546_v43 = vpop.trf.xlu0  ;;  %v253_v40 = vld [vmem:[%s2582_s0 + $0x7a8] sm:$0xff]  ;;  %v252_v41 = vld [vmem:[%s2582_s0 + $0x7a0] sm:$0xff] }
 0x1ab   :  { %988 = vst [vmem:[%s2583_s1 + $0x6a0] sm:$0xff] %v578_v42  ;;  %860 = vst [vmem:[%s2583_s1 + $0x2a0] sm:$0xff] %v546_v43 }
 0x1ae   :  { %691 = vxpose.xlu1.b32.cont [12/16] %v223_v44, 128  ;;  %v579_v46 = vpop.trf.xlu1  ;;  %659 = vxpose.xlu0.b32.cont [12/16] %v222_v45, 128  ;;  %v547_v47 = vpop.trf.xlu0  ;;  %v255_v44 = vld [vmem:[%s2582_s0 + $0x7b8] sm:$0xff]  ;;  %v254_v45 = vld [vmem:[%s2582_s0 + $0x7b0] sm:$0xff] }
 0x1af   :  { %996 = vst [vmem:[%s2583_s1 + $0x6e0] sm:$0xff] %v579_v46  ;;  %868 = vst [vmem:[%s2583_s1 + $0x2e0] sm:$0xff] %v547_v47 }
 0x1b2   :  { %692 = vxpose.xlu1.b32.cont [13/16] %v225_v48, 128  ;;  %v580_v50 = vpop.trf.xlu1  ;;  %660 = vxpose.xlu0.b32.cont [13/16] %v224_v49, 128  ;;  %v548_v51 = vpop.trf.xlu0  ;;  %v257_v48 = vld [vmem:[%s2582_s0 + $0x7c8] sm:$0xff]  ;;  %v256_v49 = vld [vmem:[%s2582_s0 + $0x7c0] sm:$0xff] }
 0x1b3   :  { %1004 = vst [vmem:[%s2583_s1 + $0x720] sm:$0xff] %v580_v50  ;;  %876 = vst [vmem:[%s2583_s1 + $0x320] sm:$0xff] %v548_v51 }
 0x1b6   :  { %693 = vxpose.xlu1.b32.cont [14/16] %v227_v52, 128  ;;  %v581_v54 = vpop.trf.xlu1  ;;  %661 = vxpose.xlu0.b32.cont [14/16] %v226_v53, 128  ;;  %v549_v55 = vpop.trf.xlu0  ;;  %v259_v52 = vld [vmem:[%s2582_s0 + $0x7d8] sm:$0xff]  ;;  %v258_v53 = vld [vmem:[%s2582_s0 + $0x7d0] sm:$0xff] }
 0x1b7   :  { %1012 = vst [vmem:[%s2583_s1 + $0x760] sm:$0xff] %v581_v54  ;;  %884 = vst [vmem:[%s2583_s1 + $0x360] sm:$0xff] %v549_v55 }
 0x1ba   :  { %694 = vxpose.xlu1.b32.cont [15/16] %v229_v56, 128  ;;  %v582_v58 = vpop.trf.xlu1  ;;  %662 = vxpose.xlu0.b32.cont [15/16] %v228_v57, 128  ;;  %v550_v59 = vpop.trf.xlu0  ;;  %v261_v56 = vld [vmem:[%s2582_s0 + $0x7e8] sm:$0xff]  ;;  %v260_v57 = vld [vmem:[%s2582_s0 + $0x7e0] sm:$0xff] }
 0x1bb   :  { %1020 = vst [vmem:[%s2583_s1 + $0x7a0] sm:$0xff] %v582_v58  ;;  %892 = vst [vmem:[%s2583_s1 + $0x3a0] sm:$0xff] %v550_v59 }
 0x1be   :  { %695 = vxpose.xlu1.b32.end [16/16] %v231_v60, 128  ;;  %v583_v62 = vpop.trf.xlu1  ;;  %663 = vxpose.xlu0.b32.end [16/16] %v230_v61, 128  ;;  %v551_v63 = vpop.trf.xlu0  ;;  %v263_v60 = vld [vmem:[%s2582_s0 + $0x7f8] sm:$0xff]  ;;  %v262_v61 = vld [vmem:[%s2582_s0 + $0x7f0] sm:$0xff] }
 0x1bf   :  { %1028 = vst [vmem:[%s2583_s1 + $0x7e0] sm:$0xff] %v583_v62  ;;  %900 = vst [vmem:[%s2583_s1 + $0x3e0] sm:$0xff] %v551_v63 }
 0x1c2   :  { %744 = vxpose.xlu1.b32.start [1/16] %v233_v0, 128  ;;  %v632_v2 = vpop.trf.xlu1  ;;  %712 = vxpose.xlu0.b32.start [1/16] %v232_v1, 128  ;;  %v600_v3 = vpop.trf.xlu0 }
 0x1c3   :  { %909 = vst [vmem:[%s2583_s1 + $0x428] sm:$0xff] %v632_v2  ;;  %781 = vst [vmem:[%s2583_s1 + $0x28] sm:$0xff] %v600_v3 }
 0x1c6   :  { %745 = vxpose.xlu1.b32.cont [2/16] %v235_v4, 128  ;;  %v633_v6 = vpop.trf.xlu1  ;;  %713 = vxpose.xlu0.b32.cont [2/16] %v234_v5, 128  ;;  %v601_v7 = vpop.trf.xlu0 }
 0x1c7   :  { %917 = vst [vmem:[%s2583_s1 + $0x468] sm:$0xff] %v633_v6  ;;  %789 = vst [vmem:[%s2583_s1 + $0x68] sm:$0xff] %v601_v7 }
 0x1ca   :  { %746 = vxpose.xlu1.b32.cont [3/16] %v237_v8, 128  ;;  %v634_v10 = vpop.trf.xlu1  ;;  %714 = vxpose.xlu0.b32.cont [3/16] %v236_v9, 128  ;;  %v602_v11 = vpop.trf.xlu0 }
 0x1cb   :  { %925 = vst [vmem:[%s2583_s1 + $0x4a8] sm:$0xff] %v634_v10  ;;  %797 = vst [vmem:[%s2583_s1 + $0xa8] sm:$0xff] %v602_v11 }
 0x1ce   :  { %747 = vxpose.xlu1.b32.cont [4/16] %v239_v12, 128  ;;  %v635_v14 = vpop.trf.xlu1  ;;  %715 = vxpose.xlu0.b32.cont [4/16] %v238_v13, 128  ;;  %v603_v15 = vpop.trf.xlu0 }
 0x1cf   :  { %933 = vst [vmem:[%s2583_s1 + $0x4e8] sm:$0xff] %v635_v14  ;;  %805 = vst [vmem:[%s2583_s1 + $0xe8] sm:$0xff] %v603_v15 }
 0x1d2   :  { %748 = vxpose.xlu1.b32.cont [5/16] %v241_v16, 128  ;;  %v636_v18 = vpop.trf.xlu1  ;;  %716 = vxpose.xlu0.b32.cont [5/16] %v240_v17, 128  ;;  %v604_v19 = vpop.trf.xlu0 }
 0x1d3   :  { %941 = vst [vmem:[%s2583_s1 + $0x528] sm:$0xff] %v636_v18  ;;  %813 = vst [vmem:[%s2583_s1 + $0x128] sm:$0xff] %v604_v19 }
 0x1d6   :  { %749 = vxpose.xlu1.b32.cont [6/16] %v243_v20, 128  ;;  %v637_v22 = vpop.trf.xlu1  ;;  %717 = vxpose.xlu0.b32.cont [6/16] %v242_v21, 128  ;;  %v605_v23 = vpop.trf.xlu0 }
 0x1d7   :  { %949 = vst [vmem:[%s2583_s1 + $0x568] sm:$0xff] %v637_v22  ;;  %821 = vst [vmem:[%s2583_s1 + $0x168] sm:$0xff] %v605_v23 }
 0x1da   :  { %750 = vxpose.xlu1.b32.cont [7/16] %v245_v24, 128  ;;  %v638_v26 = vpop.trf.xlu1  ;;  %718 = vxpose.xlu0.b32.cont [7/16] %v244_v25, 128  ;;  %v606_v27 = vpop.trf.xlu0 }
 0x1db   :  { %957 = vst [vmem:[%s2583_s1 + $0x5a8] sm:$0xff] %v638_v26  ;;  %829 = vst [vmem:[%s2583_s1 + $0x1a8] sm:$0xff] %v606_v27 }
 0x1de   :  { %751 = vxpose.xlu1.b32.cont [8/16] %v247_v28, 128  ;;  %v639_v30 = vpop.trf.xlu1  ;;  %719 = vxpose.xlu0.b32.cont [8/16] %v246_v29, 128  ;;  %v607_v31 = vpop.trf.xlu0 }
 0x1df   :  { %965 = vst [vmem:[%s2583_s1 + $0x5e8] sm:$0xff] %v639_v30  ;;  %837 = vst [vmem:[%s2583_s1 + $0x1e8] sm:$0xff] %v607_v31 }
 0x1e2   :  { %752 = vxpose.xlu1.b32.cont [9/16] %v249_v32, 128  ;;  %v640_v34 = vpop.trf.xlu1  ;;  %720 = vxpose.xlu0.b32.cont [9/16] %v248_v33, 128  ;;  %v608_v35 = vpop.trf.xlu0 }
 0x1e3   :  { %973 = vst [vmem:[%s2583_s1 + $0x628] sm:$0xff] %v640_v34  ;;  %845 = vst [vmem:[%s2583_s1 + $0x228] sm:$0xff] %v608_v35 }
 0x1e6   :  { %753 = vxpose.xlu1.b32.cont [10/16] %v251_v36, 128  ;;  %v641_v38 = vpop.trf.xlu1  ;;  %721 = vxpose.xlu0.b32.cont [10/16] %v250_v37, 128  ;;  %v609_v39 = vpop.trf.xlu0 }
 0x1e7   :  { %981 = vst [vmem:[%s2583_s1 + $0x668] sm:$0xff] %v641_v38  ;;  %853 = vst [vmem:[%s2583_s1 + $0x268] sm:$0xff] %v609_v39 }
 0x1ea   :  { %754 = vxpose.xlu1.b32.cont [11/16] %v253_v40, 128  ;;  %v642_v42 = vpop.trf.xlu1  ;;  %722 = vxpose.xlu0.b32.cont [11/16] %v252_v41, 128  ;;  %v610_v43 = vpop.trf.xlu0 }
 0x1eb   :  { %989 = vst [vmem:[%s2583_s1 + $0x6a8] sm:$0xff] %v642_v42  ;;  %861 = vst [vmem:[%s2583_s1 + $0x2a8] sm:$0xff] %v610_v43 }
 0x1ee   :  { %755 = vxpose.xlu1.b32.cont [12/16] %v255_v44, 128  ;;  %v643_v46 = vpop.trf.xlu1  ;;  %723 = vxpose.xlu0.b32.cont [12/16] %v254_v45, 128  ;;  %v611_v47 = vpop.trf.xlu0 }
 0x1ef   :  { %997 = vst [vmem:[%s2583_s1 + $0x6e8] sm:$0xff] %v643_v46  ;;  %869 = vst [vmem:[%s2583_s1 + $0x2e8] sm:$0xff] %v611_v47 }
 0x1f2   :  { %756 = vxpose.xlu1.b32.cont [13/16] %v257_v48, 128  ;;  %v644_v50 = vpop.trf.xlu1  ;;  %724 = vxpose.xlu0.b32.cont [13/16] %v256_v49, 128  ;;  %v612_v51 = vpop.trf.xlu0 }
 0x1f3   :  { %1005 = vst [vmem:[%s2583_s1 + $0x728] sm:$0xff] %v644_v50  ;;  %877 = vst [vmem:[%s2583_s1 + $0x328] sm:$0xff] %v612_v51 }
 0x1f6   :  { %757 = vxpose.xlu1.b32.cont [14/16] %v259_v52, 128  ;;  %v645_v54 = vpop.trf.xlu1  ;;  %725 = vxpose.xlu0.b32.cont [14/16] %v258_v53, 128  ;;  %v613_v55 = vpop.trf.xlu0 }
 0x1f7   :  { %1013 = vst [vmem:[%s2583_s1 + $0x768] sm:$0xff] %v645_v54  ;;  %885 = vst [vmem:[%s2583_s1 + $0x368] sm:$0xff] %v613_v55 }
 0x1fa   :  { %758 = vxpose.xlu1.b32.cont [15/16] %v261_v56, 128  ;;  %v646_v58 = vpop.trf.xlu1  ;;  %726 = vxpose.xlu0.b32.cont [15/16] %v260_v57, 128  ;;  %v614_v59 = vpop.trf.xlu0 }
 0x1fb   :  { %1021 = vst [vmem:[%s2583_s1 + $0x7a8] sm:$0xff] %v646_v58  ;;  %893 = vst [vmem:[%s2583_s1 + $0x3a8] sm:$0xff] %v614_v59 }
 0x1fe   :  { %759 = vxpose.xlu1.b32.end [16/16] %v263_v60, 128  ;;  %v647_v62 = vpop.trf.xlu1  ;;  %727 = vxpose.xlu0.b32.end [16/16] %v262_v61, 128  ;;  %v615_v63 = vpop.trf.xlu0 }
 0x1ff   :  { %1029 = vst [vmem:[%s2583_s1 + $0x7e8] sm:$0xff] %v647_v62  ;;  %901 = vst [vmem:[%s2583_s1 + $0x3e8] sm:$0xff] %v615_v63 }
 0x202   :  { %v696_v0 = vpop.trf.xlu1  ;;  %v664_v1 = vpop.trf.xlu0 }
 0x203   :  { %910 = vst [vmem:[%s2583_s1 + $0x430] sm:$0xff] %v696_v0  ;;  %782 = vst [vmem:[%s2583_s1 + $0x30] sm:$0xff] %v664_v1 }
 0x206   :  { %v697_v2 = vpop.trf.xlu1  ;;  %v665_v3 = vpop.trf.xlu0 }
 0x207   :  { %918 = vst [vmem:[%s2583_s1 + $0x470] sm:$0xff] %v697_v2  ;;  %790 = vst [vmem:[%s2583_s1 + $0x70] sm:$0xff] %v665_v3 }
 0x20a   :  { %v698_v4 = vpop.trf.xlu1  ;;  %v666_v5 = vpop.trf.xlu0 }
 0x20b   :  { %926 = vst [vmem:[%s2583_s1 + $0x4b0] sm:$0xff] %v698_v4  ;;  %798 = vst [vmem:[%s2583_s1 + $0xb0] sm:$0xff] %v666_v5 }
 0x20e   :  { %v699_v6 = vpop.trf.xlu1  ;;  %v667_v7 = vpop.trf.xlu0 }
 0x20f   :  { %934 = vst [vmem:[%s2583_s1 + $0x4f0] sm:$0xff] %v699_v6  ;;  %806 = vst [vmem:[%s2583_s1 + $0xf0] sm:$0xff] %v667_v7 }
 0x212   :  { %v700_v8 = vpop.trf.xlu1  ;;  %v668_v9 = vpop.trf.xlu0 }
 0x213   :  { %942 = vst [vmem:[%s2583_s1 + $0x530] sm:$0xff] %v700_v8  ;;  %814 = vst [vmem:[%s2583_s1 + $0x130] sm:$0xff] %v668_v9 }
 0x216   :  { %v701_v10 = vpop.trf.xlu1  ;;  %v669_v11 = vpop.trf.xlu0 }
 0x217   :  { %950 = vst [vmem:[%s2583_s1 + $0x570] sm:$0xff] %v701_v10  ;;  %822 = vst [vmem:[%s2583_s1 + $0x170] sm:$0xff] %v669_v11 }
 0x21a   :  { %v702_v12 = vpop.trf.xlu1  ;;  %v670_v13 = vpop.trf.xlu0 }
 0x21b   :  { %958 = vst [vmem:[%s2583_s1 + $0x5b0] sm:$0xff] %v702_v12  ;;  %830 = vst [vmem:[%s2583_s1 + $0x1b0] sm:$0xff] %v670_v13 }
 0x21e   :  { %v703_v14 = vpop.trf.xlu1  ;;  %v671_v15 = vpop.trf.xlu0 }
 0x21f   :  { %966 = vst [vmem:[%s2583_s1 + $0x5f0] sm:$0xff] %v703_v14  ;;  %838 = vst [vmem:[%s2583_s1 + $0x1f0] sm:$0xff] %v671_v15 }
 0x222   :  { %v704_v16 = vpop.trf.xlu1  ;;  %v672_v17 = vpop.trf.xlu0 }
 0x223   :  { %974 = vst [vmem:[%s2583_s1 + $0x630] sm:$0xff] %v704_v16  ;;  %846 = vst [vmem:[%s2583_s1 + $0x230] sm:$0xff] %v672_v17 }
 0x226   :  { %v705_v18 = vpop.trf.xlu1  ;;  %v673_v19 = vpop.trf.xlu0 }
 0x227   :  { %982 = vst [vmem:[%s2583_s1 + $0x670] sm:$0xff] %v705_v18  ;;  %854 = vst [vmem:[%s2583_s1 + $0x270] sm:$0xff] %v673_v19 }
 0x22a   :  { %v706_v20 = vpop.trf.xlu1  ;;  %v674_v21 = vpop.trf.xlu0 }
 0x22b   :  { %990 = vst [vmem:[%s2583_s1 + $0x6b0] sm:$0xff] %v706_v20  ;;  %862 = vst [vmem:[%s2583_s1 + $0x2b0] sm:$0xff] %v674_v21 }
 0x22e   :  { %v707_v22 = vpop.trf.xlu1  ;;  %v675_v23 = vpop.trf.xlu0 }
 0x22f   :  { %998 = vst [vmem:[%s2583_s1 + $0x6f0] sm:$0xff] %v707_v22  ;;  %870 = vst [vmem:[%s2583_s1 + $0x2f0] sm:$0xff] %v675_v23 }
 0x232   :  { %v708_v24 = vpop.trf.xlu1  ;;  %v676_v25 = vpop.trf.xlu0 }
 0x233   :  { %1006 = vst [vmem:[%s2583_s1 + $0x730] sm:$0xff] %v708_v24  ;;  %878 = vst [vmem:[%s2583_s1 + $0x330] sm:$0xff] %v676_v25 }
 0x236   :  { %v709_v26 = vpop.trf.xlu1  ;;  %v677_v27 = vpop.trf.xlu0 }
 0x237   :  { %1014 = vst [vmem:[%s2583_s1 + $0x770] sm:$0xff] %v709_v26  ;;  %886 = vst [vmem:[%s2583_s1 + $0x370] sm:$0xff] %v677_v27 }
 0x23a   :  { %v710_v28 = vpop.trf.xlu1  ;;  %v678_v29 = vpop.trf.xlu0 }
 0x23b   :  { %1022 = vst [vmem:[%s2583_s1 + $0x7b0] sm:$0xff] %v710_v28  ;;  %894 = vst [vmem:[%s2583_s1 + $0x3b0] sm:$0xff] %v678_v29 }
 0x23e   :  { %v711_v30 = vpop.trf.xlu1  ;;  %v679_v31 = vpop.trf.xlu0 }
 0x23f   :  { %1030 = vst [vmem:[%s2583_s1 + $0x7f0] sm:$0xff] %v711_v30  ;;  %902 = vst [vmem:[%s2583_s1 + $0x3f0] sm:$0xff] %v679_v31 }
 0x242   :  { %v760_v32 = vpop.trf.xlu1  ;;  %v728_v33 = vpop.trf.xlu0 }
 0x243   :  { %911 = vst [vmem:[%s2583_s1 + $0x438] sm:$0xff] %v760_v32  ;;  %783 = vst [vmem:[%s2583_s1 + $0x38] sm:$0xff] %v728_v33 }
 0x246   :  { %v761_v34 = vpop.trf.xlu1  ;;  %v729_v35 = vpop.trf.xlu0 }
 0x247   :  { %919 = vst [vmem:[%s2583_s1 + $0x478] sm:$0xff] %v761_v34  ;;  %791 = vst [vmem:[%s2583_s1 + $0x78] sm:$0xff] %v729_v35 }
 0x24a   :  { %v762_v36 = vpop.trf.xlu1  ;;  %v730_v37 = vpop.trf.xlu0 }
 0x24b   :  { %927 = vst [vmem:[%s2583_s1 + $0x4b8] sm:$0xff] %v762_v36  ;;  %799 = vst [vmem:[%s2583_s1 + $0xb8] sm:$0xff] %v730_v37 }
 0x24e   :  { %v763_v38 = vpop.trf.xlu1  ;;  %v731_v39 = vpop.trf.xlu0 }
 0x24f   :  { %935 = vst [vmem:[%s2583_s1 + $0x4f8] sm:$0xff] %v763_v38  ;;  %807 = vst [vmem:[%s2583_s1 + $0xf8] sm:$0xff] %v731_v39 }
 0x252   :  { %v764_v40 = vpop.trf.xlu1  ;;  %v732_v41 = vpop.trf.xlu0 }
 0x253   :  { %943 = vst [vmem:[%s2583_s1 + $0x538] sm:$0xff] %v764_v40  ;;  %815 = vst [vmem:[%s2583_s1 + $0x138] sm:$0xff] %v732_v41 }
 0x256   :  { %v765_v42 = vpop.trf.xlu1  ;;  %v733_v43 = vpop.trf.xlu0 }
 0x257   :  { %951 = vst [vmem:[%s2583_s1 + $0x578] sm:$0xff] %v765_v42  ;;  %823 = vst [vmem:[%s2583_s1 + $0x178] sm:$0xff] %v733_v43 }
 0x25a   :  { %v766_v44 = vpop.trf.xlu1  ;;  %v734_v45 = vpop.trf.xlu0 }
 0x25b   :  { %959 = vst [vmem:[%s2583_s1 + $0x5b8] sm:$0xff] %v766_v44  ;;  %831 = vst [vmem:[%s2583_s1 + $0x1b8] sm:$0xff] %v734_v45 }
 0x25e   :  { %v767_v46 = vpop.trf.xlu1  ;;  %v735_v47 = vpop.trf.xlu0 }
 0x25f   :  { %967 = vst [vmem:[%s2583_s1 + $0x5f8] sm:$0xff] %v767_v46  ;;  %839 = vst [vmem:[%s2583_s1 + $0x1f8] sm:$0xff] %v735_v47 }
 0x262   :  { %v768_v48 = vpop.trf.xlu1  ;;  %v736_v49 = vpop.trf.xlu0 }
 0x263   :  { %975 = vst [vmem:[%s2583_s1 + $0x638] sm:$0xff] %v768_v48  ;;  %847 = vst [vmem:[%s2583_s1 + $0x238] sm:$0xff] %v736_v49 }
 0x266   :  { %v769_v50 = vpop.trf.xlu1  ;;  %v737_v51 = vpop.trf.xlu0 }
 0x267   :  { %983 = vst [vmem:[%s2583_s1 + $0x678] sm:$0xff] %v769_v50  ;;  %855 = vst [vmem:[%s2583_s1 + $0x278] sm:$0xff] %v737_v51 }
 0x26a   :  { %v770_v52 = vpop.trf.xlu1  ;;  %v738_v53 = vpop.trf.xlu0 }
 0x26b   :  { %991 = vst [vmem:[%s2583_s1 + $0x6b8] sm:$0xff] %v770_v52  ;;  %863 = vst [vmem:[%s2583_s1 + $0x2b8] sm:$0xff] %v738_v53 }
 0x26e   :  { %v771_v54 = vpop.trf.xlu1  ;;  %v739_v55 = vpop.trf.xlu0 }
 0x26f   :  { %999 = vst [vmem:[%s2583_s1 + $0x6f8] sm:$0xff] %v771_v54  ;;  %871 = vst [vmem:[%s2583_s1 + $0x2f8] sm:$0xff] %v739_v55 }
 0x272   :  { %v772_v56 = vpop.trf.xlu1  ;;  %v740_v57 = vpop.trf.xlu0 }
 0x273   :  { %1007 = vst [vmem:[%s2583_s1 + $0x738] sm:$0xff] %v772_v56  ;;  %879 = vst [vmem:[%s2583_s1 + $0x338] sm:$0xff] %v740_v57 }
 0x276   :  { %v773_v58 = vpop.trf.xlu1  ;;  %v741_v59 = vpop.trf.xlu0 }
 0x277   :  { %1015 = vst [vmem:[%s2583_s1 + $0x778] sm:$0xff] %v773_v58  ;;  %887 = vst [vmem:[%s2583_s1 + $0x378] sm:$0xff] %v741_v59 }
 0x27a   :  { %v774_v60 = vpop.trf.xlu1  ;;  %v742_v61 = vpop.trf.xlu0 }
 0x27b   :  { %1023 = vst [vmem:[%s2583_s1 + $0x7b8] sm:$0xff] %v774_v60  ;;  %895 = vst [vmem:[%s2583_s1 + $0x3b8] sm:$0xff] %v742_v61 }
 0x27e   :  { %v775_v62 = vpop.trf.xlu1  ;;  %v743_v63 = vpop.trf.xlu0 }
 0x27f   :  { %1031 = vst [vmem:[%s2583_s1 + $0x7f8] sm:$0xff] %v775_v62  ;;  %903 = vst [vmem:[%s2583_s1 + $0x3f8] sm:$0xff] %v743_v63 }

</bundles_post_ra>
